<compile_context>
chip_gen: v6e
topology: v6e:2x2x1
jax: 0.10.0
libtpu: 0.0.40
codegen_flags: <defaults>
</compile_context>

<pallas_src>
import jax
import jax.numpy as jnp
from jax.experimental import pallas as pl
from jax.experimental.pallas import tpu as pltpu

HIDDEN = 8  # A3TGCN2 out_channels (hard-coded in the PyTorch module)


# ---------------------------------------------------------------------------
# Pallas kernel: per-batch A3TGCN2 recurrence + attention pooling + relu + head
# All tensors are transposed: (feature, node) with the node dim on the lane axis.
# ---------------------------------------------------------------------------
def _tgnn_kernel(probs_ref,                 # (T,)        SMEM: softmax(attention)
                 x_ref,                     # (1, T*F, N) bf16: stacked X_t^T per batch
                 aT_ref,                    # (N, N)      bf16: A_hat^T
                 wzr_ref, uzr_ref, bzr_ref, # (2H,F) (2H,H) (2H,1)  fused z|r gate params
                 wh_ref, uh_ref, bh_ref,    # (H,F)  (H,H)  (H,1)   candidate gate params
                 linw_ref, linb_ref,        # (P,H)  (P,1)          output head
                 out_ref):                  # (1, P, N)
    T = probs_ref.shape[0]
    N = x_ref.shape[2]
    F = x_ref.shape[1] // T
    H = uh_ref.shape[0]
    P = linw_ref.shape[0]

    # Hoisted graph aggregation for all T periods at once: rows [t*F:(t+1)*F] = (A @ X_t)^T.
    AX = jnp.dot(x_ref[0], aT_ref[...], preferred_element_type=jnp.float32)   # (T*F, N) f32

    Wzr = wzr_ref[...]
    Uzr = uzr_ref[...]
    Wh = wh_ref[...]
    Uh = uh_ref[...]
    # Hoist bias broadcasts out of the unrolled loop (JAX does not CSE broadcast_in_dim).
    bzr = jnp.broadcast_to(bzr_ref[...], (2 * H, N))
    bh = jnp.broadcast_to(bh_ref[...], (H, N))

    Hs = jnp.zeros((H, N), jnp.float32)      # TGCN hidden state H^T
    Hacc = jnp.zeros((H, N), jnp.float32)    # attention-weighted accumulation

    for t in range(T):                       # periods_in is small & static -> unrolled
        AXt = AX[t * F:(t + 1) * F, :]       # (F, N)  graph-mixed features of period t

        # Fused Z|R gate: one (2H, N) matmul pair instead of two concatenated gate linears.
        zr = jax.nn.sigmoid(
            jnp.dot(Wzr, AXt, preferred_element_type=jnp.float32)
            + jnp.dot(Uzr, Hs, preferred_element_type=jnp.float32) + bzr)
        Z = zr[:H, :]
        R = zr[H:, :]

        Ht = jnp.tanh(
            jnp.dot(Wh, AXt, preferred_element_type=jnp.float32)
            + jnp.dot(Uh, R * Hs, preferred_element_type=jnp.float32) + bh)

        Hs = Z * Hs + (1.0 - Z) * Ht                     # TGCN2 hidden state update
        Hacc = Hacc + probs_ref[t] * Hs                  # SMEM scalar * vector (VPU)

    h = jnp.maximum(Hacc, 0.0)                           # F.relu
    out_ref[0] = (jnp.dot(linw_ref[...], h, preferred_element_type=jnp.float32)
                  + jnp.broadcast_to(linb_ref[...], (P, N)))


# ---------------------------------------------------------------------------
# Glue: GCN symmetric normalization (add self-loops, D^-1/2 A D^-1/2) -> dense
# TODO(synk): sparse edge_index scatter has no clean BlockSpec form; built densely in plain JAX.
# ---------------------------------------------------------------------------
def _gcn_norm_dense(edge_index, edge_weight, num_nodes):
    row, col = edge_index[0], edge_index[1]
    is_self = (row == col).astype(jnp.float32)
    has_self = jnp.zeros((num_nodes,), jnp.float32).at[row].add(is_self) > 0
    loop_w = jnp.where(has_self, 0.0, 1.0)              # add_remaining_self_loops(fill=1.0)
    nodes = jnp.arange(num_nodes, dtype=edge_index.dtype)
    row_f = jnp.concatenate([row, nodes])
    col_f = jnp.concatenate([col, nodes])
    w_f = jnp.concatenate([edge_weight.astype(jnp.float32), loop_w])
    deg = jnp.zeros((num_nodes,), jnp.float32).at[col_f].add(w_f)
    dis = jnp.where(deg > 0, jax.lax.rsqrt(jnp.maximum(deg, 1e-30)), 0.0)
    norm = dis[row_f] * w_f * dis[col_f]
    # A_hat[i, j] = sum over edges j->i of norm  (message passing source_to_target)
    return jnp.zeros((num_nodes, num_nodes), jnp.float32).at[col_f, row_f].add(norm)


def temporal_gnn_forward(x, edge_index, params):
    B, N, F, T = x.shape
    H = HIDDEN
    P_out = params['lin_w'].shape[1]

    # --- graph normalization (plain JAX, tiny) ---
    ew = jax.nn.relu(params['edge_weight'])              # self.edge_weight.relu()
    A_hat = _gcn_norm_dense(edge_index, ew, N)
    A_T = A_hat.T.astype(jnp.bfloat16)                   # bf16 MXU operand, f32 accumulate

    # --- fold GCN weights/biases into the gate linears, fuse Z|R, pre-transpose ---
    lzw, lrw, lhw = params['lzw'], params['lrw'], params['lhw']
    Wz = params['wz'] @ lzw[:H]
    Wr = params['wr'] @ lrw[:H]
    Wh = params['wh'] @ lhw[:H]
    bz = params['bz'] @ lzw[:H] + params['lzb']
    br = params['br'] @ lrw[:H] + params['lrb']
    bh = params['bh'] @ lhw[:H] + params['lhb']
    Wzr_T = jnp.concatenate([Wz, Wr], axis=1).T.astype(jnp.float32)              # (2H, F)
    Uzr_T = jnp.concatenate([lzw[H:], lrw[H:]], axis=1).T.astype(jnp.float32)    # (2H, H)
    bzr_T = jnp.concatenate([bz, br], axis=1).T.astype(jnp.float32)              # (2H, 1)
    Wh_T = Wh.T.astype(jnp.float32)                                              # (H, F)
    Uh_T = lhw[H:].T.astype(jnp.float32)                                         # (H, H)
    bh_T = bh.T.astype(jnp.float32)                                              # (H, 1)
    linw_T = params['lin_w'].T.astype(jnp.float32)                               # (P, H)
    linb_T = params['lin_b'].T.astype(jnp.float32)                               # (P, 1)

    probs = jax.nn.softmax(params['attn'][0]).astype(jnp.float32)                # (T,)

    # x: (B, N, F, T) -> (B, T*F, N): time-major rows, nodes on the lane axis.
    x_k = jnp.transpose(x, (0, 3, 2, 1)).reshape(B, T * F, N).astype(jnp.bfloat16)

    def full2d(a):
        return pl.BlockSpec(a.shape, lambda b: (0, 0))   # shared across the batch grid

    out = pl.pallas_call(
        _tgnn_kernel,
        out_shape=jax.ShapeDtypeStruct((B, P_out, N), jnp.float32),
        grid=(B,),
        in_specs=[
            pl.BlockSpec(memory_space=pltpu.MemorySpace.SMEM),        # attention probs
            pl.BlockSpec((1, T * F, N), lambda b: (b, 0, 0)),         # per-batch x tile
            full2d(A_T),
            full2d(Wzr_T), full2d(Uzr_T), full2d(bzr_T),
            full2d(Wh_T), full2d(Uh_T), full2d(bh_T),
            full2d(linw_T), full2d(linb_T),
        ],
        out_specs=pl.BlockSpec((1, P_out, N), lambda b: (b, 0, 0)),
        compiler_params=pltpu.CompilerParams(
            dimension_semantics=("parallel",)),                       # 2 TCs on v7x
    )(probs, x_k, A_T, Wzr_T, Uzr_T, bzr_T, Wh_T, Uh_T, bh_T, linw_T, linb_T)

    return jnp.transpose(out, (0, 2, 1))                              # (B, N, P_out)


# ---------------------------------------------------------------------------
# Deterministic synthetic parameter init (shapes from TemporalGNN.__init__)
# ---------------------------------------------------------------------------
def init_params(key, node_features, periods_in, periods_out, num_edges):
    ks = jax.random.split(key, 12)

    def w(k, shape, scale=0.3):
        return (scale * jax.random.normal(k, shape)).astype(jnp.float32)

    return dict(
        edge_weight=jnp.full((num_edges,), 1.0 / 8, jnp.float32),
        attn=jax.random.uniform(ks[0], (1, periods_in), jnp.float32),      # A3TGCN attention
        wz=w(ks[1], (node_features, HIDDEN)),                              # GCNConv weights (F, 8)
        wr=w(ks[2], (node_features, HIDDEN)),
        wh=w(ks[3], (node_features, HIDDEN)),
        bz=w(ks[4], (1, HIDDEN), 0.1), br=w(ks[5], (1, HIDDEN), 0.1), bh=w(ks[6], (1, HIDDEN), 0.1),
        lzw=w(ks[7], (2 * HIDDEN, HIDDEN)),                                # gate Linears (16, 8)
        lrw=w(ks[8], (2 * HIDDEN, HIDDEN)),
        lhw=w(ks[9], (2 * HIDDEN, HIDDEN)),
        lzb=jnp.zeros((1, HIDDEN), jnp.float32),
        lrb=jnp.zeros((1, HIDDEN), jnp.float32),
        lhb=jnp.zeros((1, HIDDEN), jnp.float32),
        lin_w=w(ks[10], (HIDDEN, periods_out)),                            # self.linear (8, periods_out)
        lin_b=w(ks[11], (1, periods_out), 0.1),
    )


# ---------------------------------------------------------------------------
# Pure-JAX f32 reference of the same forward, for a correctness check
# ---------------------------------------------------------------------------
def reference_forward(x, edge_index, p):
    B, N, F, T = x.shape
    A = _gcn_norm_dense(edge_index, jax.nn.relu(p['edge_weight']), N)
    probs = jax.nn.softmax(p['attn'][0])
    H = jnp.zeros((B, N, HIDDEN), jnp.float32)
    H_acc = jnp.zeros((B, N, HIDDEN), jnp.float32)
    for t in range(T):
        Xt = x[:, :, :, t]
        gcn = lambda w, b: jnp.einsum('ij,bjh->bih', A, Xt @ w) + b
        Cz, Cr, Ch = gcn(p['wz'], p['bz']), gcn(p['wr'], p['br']), gcn(p['wh'], p['bh'])
        Z = jax.nn.sigmoid(jnp.concatenate([Cz, H], -1) @ p['lzw'] + p['lzb'])
        R = jax.nn.sigmoid(jnp.concatenate([Cr, H], -1) @ p['lrw'] + p['lrb'])
        Ht = jnp.tanh(jnp.concatenate([Ch, H * R], -1) @ p['lhw'] + p['lhb'])
        H = Z * H + (1.0 - Z) * Ht
        H_acc = H_acc + probs[t] * H
    return jax.nn.relu(H_acc) @ p['lin_w'] + p['lin_b']


if __name__ == "__main__":
    B, N, F, T_in, T_out, E = 2, 16, 4, 8, 4, 40
    key = jax.random.PRNGKey(0)
    kx, ke1, ke2, kp = jax.random.split(key, 4)

    x = jax.random.normal(kx, (B, N, F, T_in), jnp.float32)        # (batch, nodes, feats, periods_in)
    src = jax.random.randint(ke1, (E,), 0, N)
    dst = jax.random.randint(ke2, (E,), 0, N)
    dst = jnp.where(dst == src, (dst + 1) % N, dst)                # avoid self-loops in the synthetic graph
    edge_index = jnp.stack([src, dst]).astype(jnp.int32)           # (2, num_edges)

    params = init_params(kp, F, T_in, T_out, E)

    out = jax.block_until_ready(temporal_gnn_forward(x, edge_index, params))
    assert out.shape == (B, N, T_out), out.shape

    ref = reference_forward(x, edge_index, params)
    err = float(jnp.max(jnp.abs(out - ref)))
    # Tolerance accounts for the bf16 adjacency-matmul operands (f32 accumulation).
    if err > 5e-2:
        raise AssertionError(f"kernel/reference mismatch, max abs err = {err}")

    print("KERNEL_OK")
</pallas_src>

<mosaic_0001>
module attributes {stable_mosaic.version = 11 : i64} {
  func.func @_tgnn_kernel(%arg0: i32, %arg1: memref<8xf32, #tpu.memory_space<smem>>, %arg2: memref<1x32x16xbf16, #tpu.memory_space<vmem>>, %arg3: memref<16x16xbf16, #tpu.memory_space<vmem>>, %arg4: memref<16x4xf32, #tpu.memory_space<vmem>>, %arg5: memref<16x8xf32, #tpu.memory_space<vmem>>, %arg6: memref<16x1xf32, #tpu.memory_space<vmem>>, %arg7: memref<8x4xf32, #tpu.memory_space<vmem>>, %arg8: memref<8x8xf32, #tpu.memory_space<vmem>>, %arg9: memref<8x1xf32, #tpu.memory_space<vmem>>, %arg10: memref<4x8xf32, #tpu.memory_space<vmem>>, %arg11: memref<4x1xf32, #tpu.memory_space<vmem>>, %arg12: memref<1x4x16xf32, #tpu.memory_space<vmem>>) attributes {dimension_semantics = [#tpu.dimension_semantics<parallel>], iteration_bounds = array<i64: 2>, scalar_prefetch = 0 : i64, scratch_operands = 0 : i64, tpu.core_type = #tpu.core_type<tc>, window_params = [{transform_indices = @transform_0, window_bounds = array<i64: 8>}, {transform_indices = @transform_1, window_bounds = array<i64: 1, 32, 16>}, {pipeline_mode = #tpu.pipeline_mode<synchronous>, transform_indices = @transform_2, window_bounds = array<i64: 16, 16>}, {pipeline_mode = #tpu.pipeline_mode<synchronous>, transform_indices = @transform_3, window_bounds = array<i64: 16, 4>}, {pipeline_mode = #tpu.pipeline_mode<synchronous>, transform_indices = @transform_4, window_bounds = array<i64: 16, 8>}, {pipeline_mode = #tpu.pipeline_mode<synchronous>, transform_indices = @transform_5, window_bounds = array<i64: 16, 1>}, {pipeline_mode = #tpu.pipeline_mode<synchronous>, transform_indices = @transform_6, window_bounds = array<i64: 8, 4>}, {pipeline_mode = #tpu.pipeline_mode<synchronous>, transform_indices = @transform_7, window_bounds = array<i64: 8, 8>}, {pipeline_mode = #tpu.pipeline_mode<synchronous>, transform_indices = @transform_8, window_bounds = array<i64: 8, 1>}, {pipeline_mode = #tpu.pipeline_mode<synchronous>, transform_indices = @transform_9, window_bounds = array<i64: 4, 8>}, {pipeline_mode = #tpu.pipeline_mode<synchronous>, transform_indices = @transform_10, window_bounds = array<i64: 4, 1>}, {transform_indices = @transform_11, window_bounds = array<i64: 1, 4, 16>}]} {
    %c0 = arith.constant 0 : index
    %c0_0 = arith.constant 0 : index
    %c0_1 = arith.constant 0 : index
    %0 = vector.load %arg2[%c0, %c0_0, %c0_1] : memref<1x32x16xbf16, #tpu.memory_space<vmem>>, vector<1x32x16xbf16>
    %1 = vector.shape_cast %0 : vector<1x32x16xbf16> to vector<32x16xbf16>
    %c0_2 = arith.constant 0 : index
    %c0_3 = arith.constant 0 : index
    %2 = vector.load %arg3[%c0_2, %c0_3] : memref<16x16xbf16, #tpu.memory_space<vmem>>, vector<16x16xbf16>
    %cst = arith.constant dense<0.000000e+00> : vector<32x16xf32>
    %3 = tpu.matmul %1, %2, %cst {dimension_numbers = #tpu.dot_dimension_numbers<[1], [0], [0], [1], [0, 0, 1, 1], [], []>} : vector<32x16xbf16>, vector<16x16xbf16>, vector<32x16xf32> -> vector<32x16xf32>
    %c0_4 = arith.constant 0 : index
    %c0_5 = arith.constant 0 : index
    %4 = vector.load %arg4[%c0_4, %c0_5] : memref<16x4xf32, #tpu.memory_space<vmem>>, vector<16x4xf32>
    %c0_6 = arith.constant 0 : index
    %c0_7 = arith.constant 0 : index
    %5 = vector.load %arg5[%c0_6, %c0_7] : memref<16x8xf32, #tpu.memory_space<vmem>>, vector<16x8xf32>
    %c0_8 = arith.constant 0 : index
    %c0_9 = arith.constant 0 : index
    %6 = vector.load %arg7[%c0_8, %c0_9] : memref<8x4xf32, #tpu.memory_space<vmem>>, vector<8x4xf32>
    %c0_10 = arith.constant 0 : index
    %c0_11 = arith.constant 0 : index
    %7 = vector.load %arg8[%c0_10, %c0_11] : memref<8x8xf32, #tpu.memory_space<vmem>>, vector<8x8xf32>
    %c0_12 = arith.constant 0 : index
    %c0_13 = arith.constant 0 : index
    %8 = vector.load %arg6[%c0_12, %c0_13] : memref<16x1xf32, #tpu.memory_space<vmem>>, vector<16x1xf32>
    %9 = vector.shape_cast %8 : vector<16x1xf32> to vector<16x1xf32>
    %10 = vector.broadcast %9 : vector<16x1xf32> to vector<16x16xf32>
    %c0_14 = arith.constant 0 : index
    %c0_15 = arith.constant 0 : index
    %11 = vector.load %arg9[%c0_14, %c0_15] : memref<8x1xf32, #tpu.memory_space<vmem>>, vector<8x1xf32>
    %12 = vector.shape_cast %11 : vector<8x1xf32> to vector<8x1xf32>
    %13 = vector.broadcast %12 : vector<8x1xf32> to vector<8x16xf32>
    %cst_16 = arith.constant 0.000000e+00 : f32
    %14 = vector.broadcast %cst_16 : f32 to vector<8x16xf32>
    %cst_17 = arith.constant 0.000000e+00 : f32
    %15 = vector.broadcast %cst_17 : f32 to vector<8x16xf32>
    %16 = vector.extract_strided_slice %3 {offsets = [0, 0], sizes = [4, 16], strides = [1, 1]} : vector<32x16xf32> to vector<4x16xf32>
    %cst_18 = arith.constant dense<0.000000e+00> : vector<16x16xf32>
    %17 = tpu.matmul %4, %16, %cst_18 {dimension_numbers = #tpu.dot_dimension_numbers<[1], [0], [0], [1], [0, 0, 1, 1], [], []>} : vector<16x4xf32>, vector<4x16xf32>, vector<16x16xf32> -> vector<16x16xf32>
    %cst_19 = arith.constant dense<0.000000e+00> : vector<16x16xf32>
    %18 = tpu.matmul %5, %14, %cst_19 {dimension_numbers = #tpu.dot_dimension_numbers<[1], [0], [0], [1], [0, 0, 1, 1], [], []>} : vector<16x8xf32>, vector<8x16xf32>, vector<16x16xf32> -> vector<16x16xf32>
    %19 = arith.addf %17, %18 : vector<16x16xf32>
    %20 = arith.addf %19, %10 : vector<16x16xf32>
    %21 = arith.negf %20 : vector<16x16xf32>
    %22 = math.exp %21 : vector<16x16xf32>
    %cst_20 = arith.constant 1.000000e+00 : f32
    %23 = vector.broadcast %cst_20 : f32 to vector<16x16xf32>
    %24 = arith.addf %23, %22 : vector<16x16xf32>
    %25 = arith.divf %23, %24 : vector<16x16xf32>
    %26 = vector.extract_strided_slice %25 {offsets = [0, 0], sizes = [8, 16], strides = [1, 1]} : vector<16x16xf32> to vector<8x16xf32>
    %27 = vector.extract_strided_slice %25 {offsets = [8, 0], sizes = [8, 16], strides = [1, 1]} : vector<16x16xf32> to vector<8x16xf32>
    %cst_21 = arith.constant dense<0.000000e+00> : vector<8x16xf32>
    %28 = tpu.matmul %6, %16, %cst_21 {dimension_numbers = #tpu.dot_dimension_numbers<[1], [0], [0], [1], [0, 0, 1, 1], [], []>} : vector<8x4xf32>, vector<4x16xf32>, vector<8x16xf32> -> vector<8x16xf32>
    %29 = arith.mulf %27, %14 : vector<8x16xf32>
    %cst_22 = arith.constant dense<0.000000e+00> : vector<8x16xf32>
    %30 = tpu.matmul %7, %29, %cst_22 {dimension_numbers = #tpu.dot_dimension_numbers<[1], [0], [0], [1], [0, 0, 1, 1], [], []>} : vector<8x8xf32>, vector<8x16xf32>, vector<8x16xf32> -> vector<8x16xf32>
    %31 = arith.addf %28, %30 : vector<8x16xf32>
    %32 = arith.addf %31, %13 : vector<8x16xf32>
    %33 = math.tanh %32 : vector<8x16xf32>
    %34 = arith.mulf %26, %14 : vector<8x16xf32>
    %cst_23 = arith.constant 1.000000e+00 : f32
    %35 = vector.broadcast %cst_23 : f32 to vector<8x16xf32>
    %36 = arith.subf %35, %26 : vector<8x16xf32>
    %37 = arith.mulf %36, %33 : vector<8x16xf32>
    %38 = arith.addf %34, %37 : vector<8x16xf32>
    %c0_24 = arith.constant 0 : index
    %39 = memref.load %arg1[%c0_24] : memref<8xf32, #tpu.memory_space<smem>>
    %40 = vector.broadcast %39 : f32 to vector<8x16xf32>
    %41 = arith.mulf %40, %38 : vector<8x16xf32>
    %42 = arith.addf %15, %41 : vector<8x16xf32>
    %43 = vector.extract_strided_slice %3 {offsets = [4, 0], sizes = [4, 16], strides = [1, 1]} : vector<32x16xf32> to vector<4x16xf32>
    %cst_25 = arith.constant dense<0.000000e+00> : vector<16x16xf32>
    %44 = tpu.matmul %4, %43, %cst_25 {dimension_numbers = #tpu.dot_dimension_numbers<[1], [0], [0], [1], [0, 0, 1, 1], [], []>} : vector<16x4xf32>, vector<4x16xf32>, vector<16x16xf32> -> vector<16x16xf32>
    %cst_26 = arith.constant dense<0.000000e+00> : vector<16x16xf32>
    %45 = tpu.matmul %5, %38, %cst_26 {dimension_numbers = #tpu.dot_dimension_numbers<[1], [0], [0], [1], [0, 0, 1, 1], [], []>} : vector<16x8xf32>, vector<8x16xf32>, vector<16x16xf32> -> vector<16x16xf32>
    %46 = arith.addf %44, %45 : vector<16x16xf32>
    %47 = arith.addf %46, %10 : vector<16x16xf32>
    %48 = arith.negf %47 : vector<16x16xf32>
    %49 = math.exp %48 : vector<16x16xf32>
    %cst_27 = arith.constant 1.000000e+00 : f32
    %50 = vector.broadcast %cst_27 : f32 to vector<16x16xf32>
    %51 = arith.addf %50, %49 : vector<16x16xf32>
    %52 = arith.divf %50, %51 : vector<16x16xf32>
    %53 = vector.extract_strided_slice %52 {offsets = [0, 0], sizes = [8, 16], strides = [1, 1]} : vector<16x16xf32> to vector<8x16xf32>
    %54 = vector.extract_strided_slice %52 {offsets = [8, 0], sizes = [8, 16], strides = [1, 1]} : vector<16x16xf32> to vector<8x16xf32>
    %cst_28 = arith.constant dense<0.000000e+00> : vector<8x16xf32>
    %55 = tpu.matmul %6, %43, %cst_28 {dimension_numbers = #tpu.dot_dimension_numbers<[1], [0], [0], [1], [0, 0, 1, 1], [], []>} : vector<8x4xf32>, vector<4x16xf32>, vector<8x16xf32> -> vector<8x16xf32>
    %56 = arith.mulf %54, %38 : vector<8x16xf32>
    %cst_29 = arith.constant dense<0.000000e+00> : vector<8x16xf32>
    %57 = tpu.matmul %7, %56, %cst_29 {dimension_numbers = #tpu.dot_dimension_numbers<[1], [0], [0], [1], [0, 0, 1, 1], [], []>} : vector<8x8xf32>, vector<8x16xf32>, vector<8x16xf32> -> vector<8x16xf32>
    %58 = arith.addf %55, %57 : vector<8x16xf32>
    %59 = arith.addf %58, %13 : vector<8x16xf32>
    %60 = math.tanh %59 : vector<8x16xf32>
    %61 = arith.mulf %53, %38 : vector<8x16xf32>
    %cst_30 = arith.constant 1.000000e+00 : f32
    %62 = vector.broadcast %cst_30 : f32 to vector<8x16xf32>
    %63 = arith.subf %62, %53 : vector<8x16xf32>
    %64 = arith.mulf %63, %60 : vector<8x16xf32>
    %65 = arith.addf %61, %64 : vector<8x16xf32>
    %c1 = arith.constant 1 : index
    %66 = memref.load %arg1[%c1] : memref<8xf32, #tpu.memory_space<smem>>
    %67 = vector.broadcast %66 : f32 to vector<8x16xf32>
    %68 = arith.mulf %67, %65 : vector<8x16xf32>
    %69 = arith.addf %42, %68 : vector<8x16xf32>
    %70 = vector.extract_strided_slice %3 {offsets = [8, 0], sizes = [4, 16], strides = [1, 1]} : vector<32x16xf32> to vector<4x16xf32>
    %cst_31 = arith.constant dense<0.000000e+00> : vector<16x16xf32>
    %71 = tpu.matmul %4, %70, %cst_31 {dimension_numbers = #tpu.dot_dimension_numbers<[1], [0], [0], [1], [0, 0, 1, 1], [], []>} : vector<16x4xf32>, vector<4x16xf32>, vector<16x16xf32> -> vector<16x16xf32>
    %cst_32 = arith.constant dense<0.000000e+00> : vector<16x16xf32>
    %72 = tpu.matmul %5, %65, %cst_32 {dimension_numbers = #tpu.dot_dimension_numbers<[1], [0], [0], [1], [0, 0, 1, 1], [], []>} : vector<16x8xf32>, vector<8x16xf32>, vector<16x16xf32> -> vector<16x16xf32>
    %73 = arith.addf %71, %72 : vector<16x16xf32>
    %74 = arith.addf %73, %10 : vector<16x16xf32>
    %75 = arith.negf %74 : vector<16x16xf32>
    %76 = math.exp %75 : vector<16x16xf32>
    %cst_33 = arith.constant 1.000000e+00 : f32
    %77 = vector.broadcast %cst_33 : f32 to vector<16x16xf32>
    %78 = arith.addf %77, %76 : vector<16x16xf32>
    %79 = arith.divf %77, %78 : vector<16x16xf32>
    %80 = vector.extract_strided_slice %79 {offsets = [0, 0], sizes = [8, 16], strides = [1, 1]} : vector<16x16xf32> to vector<8x16xf32>
    %81 = vector.extract_strided_slice %79 {offsets = [8, 0], sizes = [8, 16], strides = [1, 1]} : vector<16x16xf32> to vector<8x16xf32>
    %cst_34 = arith.constant dense<0.000000e+00> : vector<8x16xf32>
    %82 = tpu.matmul %6, %70, %cst_34 {dimension_numbers = #tpu.dot_dimension_numbers<[1], [0], [0], [1], [0, 0, 1, 1], [], []>} : vector<8x4xf32>, vector<4x16xf32>, vector<8x16xf32> -> vector<8x16xf32>
    %83 = arith.mulf %81, %65 : vector<8x16xf32>
    %cst_35 = arith.constant dense<0.000000e+00> : vector<8x16xf32>
    %84 = tpu.matmul %7, %83, %cst_35 {dimension_numbers = #tpu.dot_dimension_numbers<[1], [0], [0], [1], [0, 0, 1, 1], [], []>} : vector<8x8xf32>, vector<8x16xf32>, vector<8x16xf32> -> vector<8x16xf32>
    %85 = arith.addf %82, %84 : vector<8x16xf32>
    %86 = arith.addf %85, %13 : vector<8x16xf32>
    %87 = math.tanh %86 : vector<8x16xf32>
    %88 = arith.mulf %80, %65 : vector<8x16xf32>
    %cst_36 = arith.constant 1.000000e+00 : f32
    %89 = vector.broadcast %cst_36 : f32 to vector<8x16xf32>
    %90 = arith.subf %89, %80 : vector<8x16xf32>
    %91 = arith.mulf %90, %87 : vector<8x16xf32>
    %92 = arith.addf %88, %91 : vector<8x16xf32>
    %c2 = arith.constant 2 : index
    %93 = memref.load %arg1[%c2] : memref<8xf32, #tpu.memory_space<smem>>
    %94 = vector.broadcast %93 : f32 to vector<8x16xf32>
    %95 = arith.mulf %94, %92 : vector<8x16xf32>
    %96 = arith.addf %69, %95 : vector<8x16xf32>
    %97 = vector.extract_strided_slice %3 {offsets = [12, 0], sizes = [4, 16], strides = [1, 1]} : vector<32x16xf32> to vector<4x16xf32>
    %cst_37 = arith.constant dense<0.000000e+00> : vector<16x16xf32>
    %98 = tpu.matmul %4, %97, %cst_37 {dimension_numbers = #tpu.dot_dimension_numbers<[1], [0], [0], [1], [0, 0, 1, 1], [], []>} : vector<16x4xf32>, vector<4x16xf32>, vector<16x16xf32> -> vector<16x16xf32>
    %cst_38 = arith.constant dense<0.000000e+00> : vector<16x16xf32>
    %99 = tpu.matmul %5, %92, %cst_38 {dimension_numbers = #tpu.dot_dimension_numbers<[1], [0], [0], [1], [0, 0, 1, 1], [], []>} : vector<16x8xf32>, vector<8x16xf32>, vector<16x16xf32> -> vector<16x16xf32>
    %100 = arith.addf %98, %99 : vector<16x16xf32>
    %101 = arith.addf %100, %10 : vector<16x16xf32>
    %102 = arith.negf %101 : vector<16x16xf32>
    %103 = math.exp %102 : vector<16x16xf32>
    %cst_39 = arith.constant 1.000000e+00 : f32
    %104 = vector.broadcast %cst_39 : f32 to vector<16x16xf32>
    %105 = arith.addf %104, %103 : vector<16x16xf32>
    %106 = arith.divf %104, %105 : vector<16x16xf32>
    %107 = vector.extract_strided_slice %106 {offsets = [0, 0], sizes = [8, 16], strides = [1, 1]} : vector<16x16xf32> to vector<8x16xf32>
    %108 = vector.extract_strided_slice %106 {offsets = [8, 0], sizes = [8, 16], strides = [1, 1]} : vector<16x16xf32> to vector<8x16xf32>
    %cst_40 = arith.constant dense<0.000000e+00> : vector<8x16xf32>
    %109 = tpu.matmul %6, %97, %cst_40 {dimension_numbers = #tpu.dot_dimension_numbers<[1], [0], [0], [1], [0, 0, 1, 1], [], []>} : vector<8x4xf32>, vector<4x16xf32>, vector<8x16xf32> -> vector<8x16xf32>
    %110 = arith.mulf %108, %92 : vector<8x16xf32>
    %cst_41 = arith.constant dense<0.000000e+00> : vector<8x16xf32>
    %111 = tpu.matmul %7, %110, %cst_41 {dimension_numbers = #tpu.dot_dimension_numbers<[1], [0], [0], [1], [0, 0, 1, 1], [], []>} : vector<8x8xf32>, vector<8x16xf32>, vector<8x16xf32> -> vector<8x16xf32>
    %112 = arith.addf %109, %111 : vector<8x16xf32>
    %113 = arith.addf %112, %13 : vector<8x16xf32>
    %114 = math.tanh %113 : vector<8x16xf32>
    %115 = arith.mulf %107, %92 : vector<8x16xf32>
    %cst_42 = arith.constant 1.000000e+00 : f32
    %116 = vector.broadcast %cst_42 : f32 to vector<8x16xf32>
    %117 = arith.subf %116, %107 : vector<8x16xf32>
    %118 = arith.mulf %117, %114 : vector<8x16xf32>
    %119 = arith.addf %115, %118 : vector<8x16xf32>
    %c3 = arith.constant 3 : index
    %120 = memref.load %arg1[%c3] : memref<8xf32, #tpu.memory_space<smem>>
    %121 = vector.broadcast %120 : f32 to vector<8x16xf32>
    %122 = arith.mulf %121, %119 : vector<8x16xf32>
    %123 = arith.addf %96, %122 : vector<8x16xf32>
    %124 = vector.extract_strided_slice %3 {offsets = [16, 0], sizes = [4, 16], strides = [1, 1]} : vector<32x16xf32> to vector<4x16xf32>
    %cst_43 = arith.constant dense<0.000000e+00> : vector<16x16xf32>
    %125 = tpu.matmul %4, %124, %cst_43 {dimension_numbers = #tpu.dot_dimension_numbers<[1], [0], [0], [1], [0, 0, 1, 1], [], []>} : vector<16x4xf32>, vector<4x16xf32>, vector<16x16xf32> -> vector<16x16xf32>
    %cst_44 = arith.constant dense<0.000000e+00> : vector<16x16xf32>
    %126 = tpu.matmul %5, %119, %cst_44 {dimension_numbers = #tpu.dot_dimension_numbers<[1], [0], [0], [1], [0, 0, 1, 1], [], []>} : vector<16x8xf32>, vector<8x16xf32>, vector<16x16xf32> -> vector<16x16xf32>
    %127 = arith.addf %125, %126 : vector<16x16xf32>
    %128 = arith.addf %127, %10 : vector<16x16xf32>
    %129 = arith.negf %128 : vector<16x16xf32>
    %130 = math.exp %129 : vector<16x16xf32>
    %cst_45 = arith.constant 1.000000e+00 : f32
    %131 = vector.broadcast %cst_45 : f32 to vector<16x16xf32>
    %132 = arith.addf %131, %130 : vector<16x16xf32>
    %133 = arith.divf %131, %132 : vector<16x16xf32>
    %134 = vector.extract_strided_slice %133 {offsets = [0, 0], sizes = [8, 16], strides = [1, 1]} : vector<16x16xf32> to vector<8x16xf32>
    %135 = vector.extract_strided_slice %133 {offsets = [8, 0], sizes = [8, 16], strides = [1, 1]} : vector<16x16xf32> to vector<8x16xf32>
    %cst_46 = arith.constant dense<0.000000e+00> : vector<8x16xf32>
    %136 = tpu.matmul %6, %124, %cst_46 {dimension_numbers = #tpu.dot_dimension_numbers<[1], [0], [0], [1], [0, 0, 1, 1], [], []>} : vector<8x4xf32>, vector<4x16xf32>, vector<8x16xf32> -> vector<8x16xf32>
    %137 = arith.mulf %135, %119 : vector<8x16xf32>
    %cst_47 = arith.constant dense<0.000000e+00> : vector<8x16xf32>
    %138 = tpu.matmul %7, %137, %cst_47 {dimension_numbers = #tpu.dot_dimension_numbers<[1], [0], [0], [1], [0, 0, 1, 1], [], []>} : vector<8x8xf32>, vector<8x16xf32>, vector<8x16xf32> -> vector<8x16xf32>
    %139 = arith.addf %136, %138 : vector<8x16xf32>
    %140 = arith.addf %139, %13 : vector<8x16xf32>
    %141 = math.tanh %140 : vector<8x16xf32>
    %142 = arith.mulf %134, %119 : vector<8x16xf32>
    %cst_48 = arith.constant 1.000000e+00 : f32
    %143 = vector.broadcast %cst_48 : f32 to vector<8x16xf32>
    %144 = arith.subf %143, %134 : vector<8x16xf32>
    %145 = arith.mulf %144, %141 : vector<8x16xf32>
    %146 = arith.addf %142, %145 : vector<8x16xf32>
    %c4 = arith.constant 4 : index
    %147 = memref.load %arg1[%c4] : memref<8xf32, #tpu.memory_space<smem>>
    %148 = vector.broadcast %147 : f32 to vector<8x16xf32>
    %149 = arith.mulf %148, %146 : vector<8x16xf32>
    %150 = arith.addf %123, %149 : vector<8x16xf32>
    %151 = vector.extract_strided_slice %3 {offsets = [20, 0], sizes = [4, 16], strides = [1, 1]} : vector<32x16xf32> to vector<4x16xf32>
    %cst_49 = arith.constant dense<0.000000e+00> : vector<16x16xf32>
    %152 = tpu.matmul %4, %151, %cst_49 {dimension_numbers = #tpu.dot_dimension_numbers<[1], [0], [0], [1], [0, 0, 1, 1], [], []>} : vector<16x4xf32>, vector<4x16xf32>, vector<16x16xf32> -> vector<16x16xf32>
    %cst_50 = arith.constant dense<0.000000e+00> : vector<16x16xf32>
    %153 = tpu.matmul %5, %146, %cst_50 {dimension_numbers = #tpu.dot_dimension_numbers<[1], [0], [0], [1], [0, 0, 1, 1], [], []>} : vector<16x8xf32>, vector<8x16xf32>, vector<16x16xf32> -> vector<16x16xf32>
    %154 = arith.addf %152, %153 : vector<16x16xf32>
    %155 = arith.addf %154, %10 : vector<16x16xf32>
    %156 = arith.negf %155 : vector<16x16xf32>
    %157 = math.exp %156 : vector<16x16xf32>
    %cst_51 = arith.constant 1.000000e+00 : f32
    %158 = vector.broadcast %cst_51 : f32 to vector<16x16xf32>
    %159 = arith.addf %158, %157 : vector<16x16xf32>
    %160 = arith.divf %158, %159 : vector<16x16xf32>
    %161 = vector.extract_strided_slice %160 {offsets = [0, 0], sizes = [8, 16], strides = [1, 1]} : vector<16x16xf32> to vector<8x16xf32>
    %162 = vector.extract_strided_slice %160 {offsets = [8, 0], sizes = [8, 16], strides = [1, 1]} : vector<16x16xf32> to vector<8x16xf32>
    %cst_52 = arith.constant dense<0.000000e+00> : vector<8x16xf32>
    %163 = tpu.matmul %6, %151, %cst_52 {dimension_numbers = #tpu.dot_dimension_numbers<[1], [0], [0], [1], [0, 0, 1, 1], [], []>} : vector<8x4xf32>, vector<4x16xf32>, vector<8x16xf32> -> vector<8x16xf32>
    %164 = arith.mulf %162, %146 : vector<8x16xf32>
    %cst_53 = arith.constant dense<0.000000e+00> : vector<8x16xf32>
    %165 = tpu.matmul %7, %164, %cst_53 {dimension_numbers = #tpu.dot_dimension_numbers<[1], [0], [0], [1], [0, 0, 1, 1], [], []>} : vector<8x8xf32>, vector<8x16xf32>, vector<8x16xf32> -> vector<8x16xf32>
    %166 = arith.addf %163, %165 : vector<8x16xf32>
    %167 = arith.addf %166, %13 : vector<8x16xf32>
    %168 = math.tanh %167 : vector<8x16xf32>
    %169 = arith.mulf %161, %146 : vector<8x16xf32>
    %cst_54 = arith.constant 1.000000e+00 : f32
    %170 = vector.broadcast %cst_54 : f32 to vector<8x16xf32>
    %171 = arith.subf %170, %161 : vector<8x16xf32>
    %172 = arith.mulf %171, %168 : vector<8x16xf32>
    %173 = arith.addf %169, %172 : vector<8x16xf32>
    %c5 = arith.constant 5 : index
    %174 = memref.load %arg1[%c5] : memref<8xf32, #tpu.memory_space<smem>>
    %175 = vector.broadcast %174 : f32 to vector<8x16xf32>
    %176 = arith.mulf %175, %173 : vector<8x16xf32>
    %177 = arith.addf %150, %176 : vector<8x16xf32>
    %178 = vector.extract_strided_slice %3 {offsets = [24, 0], sizes = [4, 16], strides = [1, 1]} : vector<32x16xf32> to vector<4x16xf32>
    %cst_55 = arith.constant dense<0.000000e+00> : vector<16x16xf32>
    %179 = tpu.matmul %4, %178, %cst_55 {dimension_numbers = #tpu.dot_dimension_numbers<[1], [0], [0], [1], [0, 0, 1, 1], [], []>} : vector<16x4xf32>, vector<4x16xf32>, vector<16x16xf32> -> vector<16x16xf32>
    %cst_56 = arith.constant dense<0.000000e+00> : vector<16x16xf32>
    %180 = tpu.matmul %5, %173, %cst_56 {dimension_numbers = #tpu.dot_dimension_numbers<[1], [0], [0], [1], [0, 0, 1, 1], [], []>} : vector<16x8xf32>, vector<8x16xf32>, vector<16x16xf32> -> vector<16x16xf32>
    %181 = arith.addf %179, %180 : vector<16x16xf32>
    %182 = arith.addf %181, %10 : vector<16x16xf32>
    %183 = arith.negf %182 : vector<16x16xf32>
    %184 = math.exp %183 : vector<16x16xf32>
    %cst_57 = arith.constant 1.000000e+00 : f32
    %185 = vector.broadcast %cst_57 : f32 to vector<16x16xf32>
    %186 = arith.addf %185, %184 : vector<16x16xf32>
    %187 = arith.divf %185, %186 : vector<16x16xf32>
    %188 = vector.extract_strided_slice %187 {offsets = [0, 0], sizes = [8, 16], strides = [1, 1]} : vector<16x16xf32> to vector<8x16xf32>
    %189 = vector.extract_strided_slice %187 {offsets = [8, 0], sizes = [8, 16], strides = [1, 1]} : vector<16x16xf32> to vector<8x16xf32>
    %cst_58 = arith.constant dense<0.000000e+00> : vector<8x16xf32>
    %190 = tpu.matmul %6, %178, %cst_58 {dimension_numbers = #tpu.dot_dimension_numbers<[1], [0], [0], [1], [0, 0, 1, 1], [], []>} : vector<8x4xf32>, vector<4x16xf32>, vector<8x16xf32> -> vector<8x16xf32>
    %191 = arith.mulf %189, %173 : vector<8x16xf32>
    %cst_59 = arith.constant dense<0.000000e+00> : vector<8x16xf32>
    %192 = tpu.matmul %7, %191, %cst_59 {dimension_numbers = #tpu.dot_dimension_numbers<[1], [0], [0], [1], [0, 0, 1, 1], [], []>} : vector<8x8xf32>, vector<8x16xf32>, vector<8x16xf32> -> vector<8x16xf32>
    %193 = arith.addf %190, %192 : vector<8x16xf32>
    %194 = arith.addf %193, %13 : vector<8x16xf32>
    %195 = math.tanh %194 : vector<8x16xf32>
    %196 = arith.mulf %188, %173 : vector<8x16xf32>
    %cst_60 = arith.constant 1.000000e+00 : f32
    %197 = vector.broadcast %cst_60 : f32 to vector<8x16xf32>
    %198 = arith.subf %197, %188 : vector<8x16xf32>
    %199 = arith.mulf %198, %195 : vector<8x16xf32>
    %200 = arith.addf %196, %199 : vector<8x16xf32>
    %c6 = arith.constant 6 : index
    %201 = memref.load %arg1[%c6] : memref<8xf32, #tpu.memory_space<smem>>
    %202 = vector.broadcast %201 : f32 to vector<8x16xf32>
    %203 = arith.mulf %202, %200 : vector<8x16xf32>
    %204 = arith.addf %177, %203 : vector<8x16xf32>
    %205 = vector.extract_strided_slice %3 {offsets = [28, 0], sizes = [4, 16], strides = [1, 1]} : vector<32x16xf32> to vector<4x16xf32>
    %cst_61 = arith.constant dense<0.000000e+00> : vector<16x16xf32>
    %206 = tpu.matmul %4, %205, %cst_61 {dimension_numbers = #tpu.dot_dimension_numbers<[1], [0], [0], [1], [0, 0, 1, 1], [], []>} : vector<16x4xf32>, vector<4x16xf32>, vector<16x16xf32> -> vector<16x16xf32>
    %cst_62 = arith.constant dense<0.000000e+00> : vector<16x16xf32>
    %207 = tpu.matmul %5, %200, %cst_62 {dimension_numbers = #tpu.dot_dimension_numbers<[1], [0], [0], [1], [0, 0, 1, 1], [], []>} : vector<16x8xf32>, vector<8x16xf32>, vector<16x16xf32> -> vector<16x16xf32>
    %208 = arith.addf %206, %207 : vector<16x16xf32>
    %209 = arith.addf %208, %10 : vector<16x16xf32>
    %210 = arith.negf %209 : vector<16x16xf32>
    %211 = math.exp %210 : vector<16x16xf32>
    %cst_63 = arith.constant 1.000000e+00 : f32
    %212 = vector.broadcast %cst_63 : f32 to vector<16x16xf32>
    %213 = arith.addf %212, %211 : vector<16x16xf32>
    %214 = arith.divf %212, %213 : vector<16x16xf32>
    %215 = vector.extract_strided_slice %214 {offsets = [0, 0], sizes = [8, 16], strides = [1, 1]} : vector<16x16xf32> to vector<8x16xf32>
    %216 = vector.extract_strided_slice %214 {offsets = [8, 0], sizes = [8, 16], strides = [1, 1]} : vector<16x16xf32> to vector<8x16xf32>
    %cst_64 = arith.constant dense<0.000000e+00> : vector<8x16xf32>
    %217 = tpu.matmul %6, %205, %cst_64 {dimension_numbers = #tpu.dot_dimension_numbers<[1], [0], [0], [1], [0, 0, 1, 1], [], []>} : vector<8x4xf32>, vector<4x16xf32>, vector<8x16xf32> -> vector<8x16xf32>
    %218 = arith.mulf %216, %200 : vector<8x16xf32>
    %cst_65 = arith.constant dense<0.000000e+00> : vector<8x16xf32>
    %219 = tpu.matmul %7, %218, %cst_65 {dimension_numbers = #tpu.dot_dimension_numbers<[1], [0], [0], [1], [0, 0, 1, 1], [], []>} : vector<8x8xf32>, vector<8x16xf32>, vector<8x16xf32> -> vector<8x16xf32>
    %220 = arith.addf %217, %219 : vector<8x16xf32>
    %221 = arith.addf %220, %13 : vector<8x16xf32>
    %222 = math.tanh %221 : vector<8x16xf32>
    %223 = arith.mulf %215, %200 : vector<8x16xf32>
    %cst_66 = arith.constant 1.000000e+00 : f32
    %224 = vector.broadcast %cst_66 : f32 to vector<8x16xf32>
    %225 = arith.subf %224, %215 : vector<8x16xf32>
    %226 = arith.mulf %225, %222 : vector<8x16xf32>
    %227 = arith.addf %223, %226 : vector<8x16xf32>
    %c7 = arith.constant 7 : index
    %228 = memref.load %arg1[%c7] : memref<8xf32, #tpu.memory_space<smem>>
    %229 = vector.broadcast %228 : f32 to vector<8x16xf32>
    %230 = arith.mulf %229, %227 : vector<8x16xf32>
    %231 = arith.addf %204, %230 : vector<8x16xf32>
    %cst_67 = arith.constant 0.000000e+00 : f32
    %232 = vector.broadcast %cst_67 : f32 to vector<8x16xf32>
    %233 = arith.maximumf %231, %232 : vector<8x16xf32>
    %c0_68 = arith.constant 0 : index
    %c0_69 = arith.constant 0 : index
    %234 = vector.load %arg10[%c0_68, %c0_69] : memref<4x8xf32, #tpu.memory_space<vmem>>, vector<4x8xf32>
    %cst_70 = arith.constant dense<0.000000e+00> : vector<4x16xf32>
    %235 = tpu.matmul %234, %233, %cst_70 {dimension_numbers = #tpu.dot_dimension_numbers<[1], [0], [0], [1], [0, 0, 1, 1], [], []>} : vector<4x8xf32>, vector<8x16xf32>, vector<4x16xf32> -> vector<4x16xf32>
    %c0_71 = arith.constant 0 : index
    %c0_72 = arith.constant 0 : index
    %236 = vector.load %arg11[%c0_71, %c0_72] : memref<4x1xf32, #tpu.memory_space<vmem>>, vector<4x1xf32>
    %237 = vector.shape_cast %236 : vector<4x1xf32> to vector<4x1xf32>
    %238 = vector.broadcast %237 : vector<4x1xf32> to vector<4x16xf32>
    %239 = arith.addf %235, %238 : vector<4x16xf32>
    %c0_73 = arith.constant 0 : index
    %c0_74 = arith.constant 0 : index
    %c0_75 = arith.constant 0 : index
    %240 = vector.load %arg12[%c0_73, %c0_74, %c0_75] : memref<1x4x16xf32, #tpu.memory_space<vmem>>, vector<1x4x16xf32>
    %241 = vector.shape_cast %240 : vector<1x4x16xf32> to vector<4x16xf32>
    %242 = vector.shape_cast %239 : vector<4x16xf32> to vector<1x4x16xf32>
    tpu.vector_store %arg12[%c0_73, %c0_74, %c0_75], %242 {strides = array<i32>} : memref<1x4x16xf32, #tpu.memory_space<vmem>>, vector<1x4x16xf32>,
    return
  }
  func.func @transform_0(%arg0: i32) -> i32 {
    %c0_i32 = arith.constant 0 : i32
    %c0_i32_0 = arith.constant 0 : i32
    return %c0_i32 : i32
  }
  func.func @transform_1(%arg0: i32) -> (i32, i32, i32) {
    %c0_i32 = arith.constant 0 : i32
    %c0_i32_0 = arith.constant 0 : i32
    %c0_i32_1 = arith.constant 0 : i32
    return %arg0, %c0_i32, %c0_i32_0 : i32, i32, i32
  }
  func.func @transform_2(%arg0: i32) -> (i32, i32) {
    %c0_i32 = arith.constant 0 : i32
    %c0_i32_0 = arith.constant 0 : i32
    %c0_i32_1 = arith.constant 0 : i32
    return %c0_i32, %c0_i32_0 : i32, i32
  }
  func.func @transform_3(%arg0: i32) -> (i32, i32) {
    %c0_i32 = arith.constant 0 : i32
    %c0_i32_0 = arith.constant 0 : i32
    %c0_i32_1 = arith.constant 0 : i32
    return %c0_i32, %c0_i32_0 : i32, i32
  }
  func.func @transform_4(%arg0: i32) -> (i32, i32) {
    %c0_i32 = arith.constant 0 : i32
    %c0_i32_0 = arith.constant 0 : i32
    %c0_i32_1 = arith.constant 0 : i32
    return %c0_i32, %c0_i32_0 : i32, i32
  }
  func.func @transform_5(%arg0: i32) -> (i32, i32) {
    %c0_i32 = arith.constant 0 : i32
    %c0_i32_0 = arith.constant 0 : i32
    %c0_i32_1 = arith.constant 0 : i32
    return %c0_i32, %c0_i32_0 : i32, i32
  }
  func.func @transform_6(%arg0: i32) -> (i32, i32) {
    %c0_i32 = arith.constant 0 : i32
    %c0_i32_0 = arith.constant 0 : i32
    %c0_i32_1 = arith.constant 0 : i32
    return %c0_i32, %c0_i32_0 : i32, i32
  }
  func.func @transform_7(%arg0: i32) -> (i32, i32) {
    %c0_i32 = arith.constant 0 : i32
    %c0_i32_0 = arith.constant 0 : i32
    %c0_i32_1 = arith.constant 0 : i32
    return %c0_i32, %c0_i32_0 : i32, i32
  }
  func.func @transform_8(%arg0: i32) -> (i32, i32) {
    %c0_i32 = arith.constant 0 : i32
    %c0_i32_0 = arith.constant 0 : i32
    %c0_i32_1 = arith.constant 0 : i32
    return %c0_i32, %c0_i32_0 : i32, i32
  }
  func.func @transform_9(%arg0: i32) -> (i32, i32) {
    %c0_i32 = arith.constant 0 : i32
    %c0_i32_0 = arith.constant 0 : i32
    %c0_i32_1 = arith.constant 0 : i32
    return %c0_i32, %c0_i32_0 : i32, i32
  }
  func.func @transform_10(%arg0: i32) -> (i32, i32) {
    %c0_i32 = arith.constant 0 : i32
    %c0_i32_0 = arith.constant 0 : i32
    %c0_i32_1 = arith.constant 0 : i32
    return %c0_i32, %c0_i32_0 : i32, i32
  }
  func.func @transform_11(%arg0: i32) -> (i32, i32, i32) {
    %c0_i32 = arith.constant 0 : i32
    %c0_i32_0 = arith.constant 0 : i32
    %c0_i32_1 = arith.constant 0 : i32
    return %arg0, %c0_i32, %c0_i32_0 : i32, i32, i32
  }
}

</mosaic_0001>

<bundles_post_ra>
// kernel: tpu_custom_call.1
= control target key start
LH: loop header
LB: loop body
LE: loop exit
PB: predicated region body
PF: predicated region fallthrough
CT: control target
= control target key end

     0   :  { %s4294_s0 = inlined_call_operand.vmem [shape: f32[8], index: 0, kind: input, shape index: {}]   ;;  %s4295_s1 = inlined_call_operand.vmem [shape: bf16[2,32,16], index: 1, kind: input, shape index: {}]   ;;  %s4296_s2 = inlined_call_operand.vmem [shape: bf16[16,16], index: 2, kind: input, shape index: {}]   ;;  %s4297_s3 = inlined_call_operand.vmem [shape: f32[16,4], index: 3, kind: input, shape index: {}]   ;;  %s4298_s4 = inlined_call_operand.vmem [shape: f32[16,8], index: 4, kind: input, shape index: {}]   ;;  %s4299_s5 = inlined_call_operand.vmem [shape: f32[16,1], index: 5, kind: input, shape index: {}]   ;;  %s4300_s6 = inlined_call_operand.vmem [shape: f32[8,4], index: 6, kind: input, shape index: {}]   ;;  %s4301_s7 = inlined_call_operand.vmem [shape: f32[8,8], index: 7, kind: input, shape index: {}]   ;;  %s4302_s8 = inlined_call_operand.vmem [shape: f32[8,1], index: 8, kind: input, shape index: {}]   ;;  %s4303_s9 = inlined_call_operand.vmem [shape: f32[4,8], index: 9, kind: input, shape index: {}]   ;;  %s4304_s10 = inlined_call_operand.vmem [shape: f32[4,1], index: 10, kind: input, shape index: {}]   ;;  %s4305_s11 = inlined_call_operand.hbm [shape: f32[2,4,16], index: 11, kind: output, shape index: {}]  }
   0x1   :  { %4306 = sst [smem:[#allocation8_spill]] %s4294_s0 }
   0x2   :  { %16 = vsyncpa [#allocation4], 0 }
   0x3   :  { %17 = vsyncpa [#allocation3], 0 }
   0x4   :  { %19 = vsyncpa [#allocation3 + $0x1], 0  ;;  %s3882_s17 = smov 0   ;;  %s3884_s18 = smov 0  }
   0x5   :  { %s3886_s19 = smov 0   ;;  %s3888_s20 = smov 0  }
   0x6 LB: > { %s3903_s21 = sadd.s32 4294967295, %s3815_s20   ;;  %s3235_s22 = sadd.s32 4294967294, %s3815_s20   ;;  %s3815_s20 = sphi %s3888_s20, %s4314_s20   ;;  %s3811_s19 = sphi %s3886_s19, %s4313_s19   ;;  %s3807_s18 = sphi %s3884_s18, %s4312_s18   ;;  %s3803_s17 = sphi %s3882_s17, %s4311_s17  }
   0x7   : > { %s3907_s23 = sadd.s32 1, %s3815_s20   ;;  %s268_s24 = sadd.s32 1, %s3811_s19 }
   0x8   : > { %s265_s25 = ssub.s32 %s3815_s20, %s3907_s23  ;;  %p278_p0 = scmp.ne.s32.totalorder %s3811_s19, %s3807_s18 }
   0x9   : > { %p266_p1 = scmp.eq.s32.totalorder %s265_s25, 0  ;;  %p279_p2 = scmp.eq.s32.totalorder %s3903_s21, 1 }
   0xa   : > { %p284_p3 = scmp.ne.s32.totalorder %s3807_s18, %s3803_s17  ;;  %p285_p4 = scmp.eq.s32.totalorder %s3235_s22, 1 }
   0xb   : > { %s3918_s26 = scalar_select %p266_p1, %s3811_s19, %s268_s24  }
   0xc   : > { %p3920_p5 = por %p279_p2, %p278_p0  ;;  %p3924_p6 = por %p285_p4, %p284_p3 }
   0xd   : > { %p3236_p7 = scmp.ge.s32.totalorder %s3815_s20, 1  ;;  %p292_p8 = scmp.lt.s32.totalorder %s3815_s20, 3 }
   0xe   : > { %p3612_p9 = scmp.eq.s32.totalorder %s3903_s21, 0  ;;  %s4310_s0 = sld [smem:[#allocation8_spill]] }
   0xf   : > { %p3931_p10 = pnand %p3236_p7, %p292_p8 }
  0x11   : > { %p3604_p11 = pneg %p3931_p10 }
  0x13   : > { %p3605_p12 = pnand %p3612_p9, %p3604_p11 }
  0x14   : > { %s305_s13 = sshll.u32 %s4310_s0, 4  ;;  %s306_s13 = int_to_ptr.vmem [resolvable:$true] %s305_s13 }
  0x15   : > { %s3736_s14 = scalar_lea.vmem %s306_s13, 16  ;;  %p3738_p0 = pneg %p3605_p12 }
  0x16   : > { %p3737_p13 = scmp.ne.s32.totalorder %s306_s13, %s3736_s14  ;;  %p3744_p3 = scmp.lt.s32.totalorder %s306_s13, %s306_s13 }
  0x17   : > { %p3745_p4 = scmp.lt.s32.totalorder %s3736_s14, %s3736_s14 }
  0x18   : > { %p3739_p1 = pnand %p3738_p0, %p3737_p13 }
  0x19   : > { %p3746_p7 = por %p3745_p4, %p3744_p3 }
  0x1a   : > { %p3740_p2 = pneg %p3739_p1 }
  0x1c   : > { %p3747_p8 = pnand %p3746_p7, %p3740_p2 }
  0x1e   : > { %3750 = shalt.err (!%p3747_p8)
}
  0x1f   : > { %s3817_s15 = smov [#allocation2]   ;;  %353 = sbr.rel (%p3931_p10) target bundleno = 4049 (0xfd1), region = 64 }
  0x20   : > { %3607 = dma.vmem_to_smem (!%p3605_p12), %s306_s13, 16, %s3817_s15, [#allocation4]  }
  0x24   : > { %3794 = dma.done.wait (%p3612_p9), [#allocation4], 16  }
  0x25   : > { %3796 = vsyncadd (%p3612_p9), [#allocation4], 4294967280 }
  0x26   : > { %359 = sfence }
  0x27   : > { %v3653_v0 = vld [vmem:[%s4296_s2] sm:$0xff]   ;;  %p394_p11 = scmp.lt.s32.totalorder %s3903_s21, 1  ;;  %vm502_vm0 = vcmask 64512   ;;  %v3818_v2 = vmov 0.0   ;;  %v3962_v3 = vld [vmem:[%s4298_s4 + $0x8] sm:$0xff]  ;;  %vm422_vm1 = vcmask 130048  }
  0x28   : > { %v3955_v1 = vld [vmem:[%s4298_s4] sm:$0xff]  ;;  %3427 = vmatprep.subr.bf16.mxu0 %v3653_v0  ;;  %3433 = vmatprep.subr.mxu1 %v3818_v2  ;;  %vm3819_vm2 = vmmov 0   ;;  %vm584_vm3 = vcmask 31744   ;;  %v485_v7 = vld [vmem:[%s4299_s5 + $0x8] sm:$0xff]  ;;  %v3820_v8 = vmov 0   ;;  %vm591_vm4 = vcmask 1043456  }
  0x29   : > { %s395_s29 = scalar_select %p394_p11, %s3903_s21, 1  ;;  %3428 = vmatpush3.bf16.msra.mxu0 %v3653_v0  ;;  %3434 = vmatpush3.msra.mxu1 %v3818_v2  ;;  %v3978_v6 = vld [vmem:[%s4297_s3] sm:$0xff]  ;;  %v3996_v13 = vld [vmem:[%s4297_s3 + $0x8] sm:$0xff]  ;;  %vm3148_vm5 = vcmask 125952  }
  0x2a   : > { %3435 = vmatprep.mubr.msk.f32.mxu1 %vm502_vm0, %v3955_v1  ;;  %3448 = vmatprep.subr.mxu0 %v3818_v2  ;;  %v484_v9 = vld [vmem:[%s4299_s5] sm:$0xff]  ;;  %s837_s14 = sld [smem:[#allocation2]] }
  0x2b   : > { %s3341_s13 = sshll.u32 %s395_s29, 4  ;;  %3436 = vmatmul.mubr.msk.f32.vlgmr.msra.gmra.mxu1 %vm502_vm0, %v3962_v3  ;;  %3651 = vset.pattern.permute.xlu0 %v3820_v8  ;;  %v3991_v11 = vld [vmem:[%s4300_s6] sm:$0xff]  ;;  %s3280_s15 = sld [smem:[#allocation2 + $0x2]] }
  0x2c   : > { %s398_s16 = scalar_lea.vmem %s4295_s1, %s3341_s13  ;;  %3440 = vmatprep.mubr.msk.f32.mxu1 %vm584_vm3, %v3978_v6  ;;  %3652 = vset.pattern.permute.xlu1 %v3820_v8  ;;  %v496_v20 = vld [vmem:[%s4302_s8] sm:$0xff]  ;;  %s3269_s13 = sld [smem:[#allocation2 + $0x1]] }
  0x2d   : > { %v3654_v4 = vld [vmem:[%s398_s16] sm:$0xff]   ;;  %v3655_v5 = vld [vmem:[%s398_s16 + $0x8] sm:$0xff]   ;;  %493 = vperm.xlu0 %3651, %v485_v7   ;;  %499 = vperm.xlu1 %3652, %v496_v20   ;;  %s3291_s16 = sld [smem:[#allocation2 + $0x3]] }
  0x2e   : > { %3429 = vmatprep.mubr.msk.bf16.mxu0 %vm422_vm1, %v3654_v4  ;;  %v3069_v21 = vld [vmem:[%s4304_s10] sm:$0xf]  ;;  %s3302_s22 = sld [smem:[#allocation2 + $0x4]] }
  0x2f   : > { %3430 = vmatmul.mubr.msk.bf16.vlgmr.msra.gmra.mxu0 %vm422_vm1, %v3655_v5  ;;  %v4104_v35 = vld [vmem:[%s4301_s7] sm:$0xff]  ;;  %s3313_s24 = sld [smem:[#allocation2 + $0x5]] }
  0x30   : > { %3450 = vmatprep.mubr.msk.f32.mxu0 %vm3819_vm2, %v3818_v2  ;;  %s3324_s25 = sld [smem:[#allocation2 + $0x6]] }
  0x31   : > { %488 = vperm.xlu0 %3651, %v484_v9   ;;  %3072 = vperm.xlu1 %3652, %v3069_v21   ;;  %s3335_s29 = sld [smem:[#allocation2 + $0x7]] }
  0xa8   : > { %v4098_v28 = vpop.permute.xlu0 %493  ;;  %v4113_v45 = vpop.permute.xlu1 %499 }
  0xac   : > { %v4110_v38 = vpop.permute.xlu0 %488 }
  0xeb   : > { %v3437_v22 = vpop.f32.mrf.mxu1 }
  0xed   : > { %v575_v23 = vpop.f32.mrf.mxu1 }
  0xef   : > { %v3431_v10 = vpop.f32.mrf.mxu0 }
  0xf0   : > { %v2188_v18 = vrot.slane %v3431_v10, 4 }
  0xf1   : > { %v463_v12 = vpop.f32.mrf.mxu0 }
  0xf2   : > { %v916_v14 = vrot.slane %v463_v12, 4  ;;  %3438 = vmatprep.subr.msk.mxu1 %vm591_vm4, %v463_v12  ;;  %3449 = vmatpush3.msk.msra.mxu0 %vm591_vm4, %v463_v12 }
  0xf3   : > { %3439 = vmatpush3.msk.msra.mxu1 %vm591_vm4, %v463_v12  ;;  %3451 = vmatmul.mubr.msk.f32.vlgmr.msra.gmra.mxu0 %vm584_vm3, %v3991_v11  ;;  %v3432_v15 = vpop.f32.mrf.mxu0 }
  0xf4   : > { %3441 = vmatmul.mubr.msk.f32.vlgmr.msra.gmra.mxu1 %vm584_vm3, %v3996_v13  ;;  %3458 = vmatprep.subr.msk.mxu0 %vm591_vm4, %v916_v14  ;;  %v2824_v19 = vrot.slane %v3432_v15, 4 }
  0xf5   : > { %3459 = vmatpush3.msk.msra.mxu0 %vm591_vm4, %v916_v14  ;;  %3460 = vmatprep.mubr.msk.f32.mxu0 %vm584_vm3, %v3978_v6  ;;  %v466_v16 = vpop.f32.mrf.mxu0 }
  0xf6   : > { %3468 = vmatprep.subr.mxu0 %v3818_v2  ;;  %3443 = vmatprep.subr.mxu1 %v3818_v2  ;;  %v1552_v17 = vrot.slane %v466_v16, 4 }
  0xf7   : > { %3461 = vmatmul.mubr.msk.f32.vlgmr.msra.gmra.mxu0 %vm584_vm3, %v3996_v13  ;;  %3445 = vmatprep.mubr.msk.f32.mxu1 %vm3819_vm2, %v3818_v2 }
  0xf8   : > { %3469 = vmatpush3.msk.msra.mxu0 %vm591_vm4, %v916_v14  ;;  %3470 = vmatprep.mubr.msk.f32.mxu0 %vm3819_vm2, %v3818_v2 }
  0xf9   : > { %3478 = vmatprep.subr.msk.mxu0 %vm591_vm4, %v466_v16 }
  0xfb   : > { %3471 = vmatmul.mubr.msk.f32.vlgmr.msra.gmra.mxu0 %vm584_vm3, %v3991_v11 }
  0xfc   : > { %3479 = vmatpush3.msk.msra.mxu0 %vm591_vm4, %v466_v16  ;;  %3480 = vmatprep.mubr.msk.f32.mxu0 %vm584_vm3, %v3978_v6 }
  0xfd   : > { %3488 = vmatprep.subr.mxu0 %v3818_v2 }
  0xff   : > { %3481 = vmatmul.mubr.msk.f32.vlgmr.msra.gmra.mxu0 %vm584_vm3, %v3996_v13 }
 0x100   : > { %3489 = vmatpush3.msk.msra.mxu0 %vm591_vm4, %v466_v16  ;;  %3490 = vmatprep.mubr.msk.f32.mxu0 %vm3819_vm2, %v3818_v2 }
 0x101   : > { %3498 = vmatprep.subr.msk.mxu0 %vm591_vm4, %v1552_v17 }
 0x103   : > { %3491 = vmatmul.mubr.msk.f32.vlgmr.msra.gmra.mxu0 %vm584_vm3, %v3991_v11 }
 0x104   : > { %3499 = vmatpush3.msk.msra.mxu0 %vm591_vm4, %v1552_v17  ;;  %3500 = vmatprep.mubr.msk.f32.mxu0 %vm584_vm3, %v3978_v6 }
 0x105   : > { %3508 = vmatprep.subr.mxu0 %v3818_v2 }
 0x107   : > { %3501 = vmatmul.mubr.msk.f32.vlgmr.msra.gmra.mxu0 %vm584_vm3, %v3996_v13 }
 0x108   : > { %3509 = vmatpush3.msk.msra.mxu0 %vm591_vm4, %v1552_v17  ;;  %3510 = vmatprep.mubr.msk.f32.mxu0 %vm3819_vm2, %v3818_v2 }
 0x109   : > { %3518 = vmatprep.subr.msk.mxu0 %vm591_vm4, %v3431_v10 }
 0x10b   : > { %3511 = vmatmul.mubr.msk.f32.vlgmr.msra.gmra.mxu0 %vm584_vm3, %v3991_v11 }
 0x10c   : > { %3519 = vmatpush3.msk.msra.mxu0 %vm591_vm4, %v3431_v10  ;;  %3520 = vmatprep.mubr.msk.f32.mxu0 %vm584_vm3, %v3978_v6 }
 0x10d   : > { %3528 = vmatprep.subr.mxu0 %v3818_v2 }
 0x10f   : > { %3521 = vmatmul.mubr.msk.f32.vlgmr.msra.gmra.mxu0 %vm584_vm3, %v3996_v13 }
 0x110   : > { %3529 = vmatpush3.msk.msra.mxu0 %vm591_vm4, %v3431_v10  ;;  %3530 = vmatprep.mubr.msk.f32.mxu0 %vm3819_vm2, %v3818_v2 }
 0x111   : > { %3538 = vmatprep.subr.msk.mxu0 %vm591_vm4, %v2188_v18 }
 0x113   : > { %3531 = vmatmul.mubr.msk.f32.vlgmr.msra.gmra.mxu0 %vm584_vm3, %v3991_v11 }
 0x114   : > { %3539 = vmatpush3.msk.msra.mxu0 %vm591_vm4, %v2188_v18  ;;  %3540 = vmatprep.mubr.msk.f32.mxu0 %vm584_vm3, %v3978_v6 }
 0x115   : > { %3548 = vmatprep.subr.mxu0 %v3818_v2 }
 0x117   : > { %3541 = vmatmul.mubr.msk.f32.vlgmr.msra.gmra.mxu0 %vm584_vm3, %v3996_v13 }
 0x118   : > { %3549 = vmatpush3.msk.msra.mxu0 %vm591_vm4, %v2188_v18  ;;  %3550 = vmatprep.mubr.msk.f32.mxu0 %vm3819_vm2, %v3818_v2 }
 0x119   : > { %3558 = vmatprep.subr.msk.mxu0 %vm591_vm4, %v3432_v15 }
 0x11b   : > { %3551 = vmatmul.mubr.msk.f32.vlgmr.msra.gmra.mxu0 %vm584_vm3, %v3991_v11 }
 0x11c   : > { %3559 = vmatpush3.msk.msra.mxu0 %vm591_vm4, %v3432_v15  ;;  %3560 = vmatprep.mubr.msk.f32.mxu0 %vm584_vm3, %v3978_v6 }
 0x11d   : > { %3568 = vmatprep.subr.mxu0 %v3818_v2 }
 0x11f   : > { %3561 = vmatmul.mubr.msk.f32.vlgmr.msra.gmra.mxu0 %vm584_vm3, %v3996_v13 }
 0x120   : > { %3569 = vmatpush3.msk.msra.mxu0 %vm591_vm4, %v3432_v15  ;;  %3570 = vmatprep.mubr.msk.f32.mxu0 %vm3819_vm2, %v3818_v2 }
 0x121   : > { %3578 = vmatprep.subr.msk.mxu0 %vm591_vm4, %v2824_v19 }
 0x123   : > { %3571 = vmatmul.mubr.msk.f32.vlgmr.msra.gmra.mxu0 %vm584_vm3, %v3991_v11 }
 0x124   : > { %3579 = vmatpush3.msk.msra.mxu0 %vm591_vm4, %v2824_v19  ;;  %3580 = vmatprep.mubr.msk.f32.mxu0 %vm584_vm3, %v3978_v6 }
 0x125   : > { %3588 = vmatprep.subr.mxu0 %v3818_v2 }
 0x127   : > { %3581 = vmatmul.mubr.msk.f32.vlgmr.msra.gmra.mxu0 %vm584_vm3, %v3996_v13 }
 0x128   : > { %3589 = vmatpush3.msk.msra.mxu0 %vm591_vm4, %v2824_v19  ;;  %3590 = vmatprep.mubr.msk.f32.mxu0 %vm3819_vm2, %v3818_v2 }
 0x12b   : > { %3591 = vmatmul.mubr.msk.f32.vlgmr.msra.gmra.mxu0 %vm584_vm3, %v3991_v11 }
 0x1b3   : > { %v827_v24 = vpop.f32.mrf.mxu0 }
 0x1b4   : > { %v3442_v25 = vpop.f32.mrf.mxu1 }
 0x1b5   : > { %v667_v26 = vadd.f32 %v3442_v25, %v3437_v22  ;;  %v3452_v27 = vpop.f32.mrf.mxu0 }
 0x1b6   : > { %v661_v36 = vpop.f32.mrf.mxu1 }
 0x1b7   : > { %v671_v29 = vadd.f32 %v667_v26, %v4098_v28  ;;  %v662_v37 = vadd.f32 %v661_v36, %v575_v23  ;;  %v3462_v54 = vpop.f32.mrf.mxu0 }
 0x1b9   : > { %v3255_v30 = vmul.f32 -1.442695, %v671_v29  ;;  %v670_v39 = vadd.f32 %v662_v37, %v4110_v38  ;;  %v985_v55 = vpop.f32.mrf.mxu0 }
 0x1bb   : > { %3656 = vpow2.f32 %v3255_v30  ;;  %v3254_v40 = vmul.f32 -1.442695, %v670_v39  ;;  %v1145_v56 = vpop.f32.mrf.mxu0 }
 0x1bd   : > { %v3472_v57 = vpop.f32.mrf.mxu0 }
 0x1bf   : > { %v3482_v21 = vpop.f32.mrf.mxu0 }
 0x1c1   : > { %v1303_v22 = vpop.f32.mrf.mxu0 }
 0x1c3   : > { %v1463_v23 = vpop.f32.mrf.mxu0 }
 0x1c8   : > { %v3657_v31 = vpop.eup %3656 }
 0x1c9   : > { %v679_v32 = vadd.f32 1.0, %v3657_v31 }
 0x1cb   : > { %3658 = vrcp.f32 %v679_v32 }
 0x1cc   : > { %3660 = vpow2.f32 %v3254_v40 }
 0x1d8   : > { %v3659_v33 = vpop.eup %3658 }
 0x1d9   : > { %v684_v34 = vmul.f32 0.0, %v3659_v33  ;;  %v3661_v41 = vpop.eup %3660 }
 0x1da   : > { %v678_v42 = vadd.f32 1.0, %v3661_v41 }
 0x1db   : > { %3444 = vmatpush3.msra.mxu1 %v684_v34 }
 0x1dc   : > { %3446 = vmatmul.mubr.msk.f32.vlgmr.msra.gmra.mxu1 %vm502_vm0, %v4104_v35  ;;  %3662 = vrcp.f32 %v678_v42 }
 0x1dd   : > { %3455 = vmatprep.mubr.msk.f32.mxu1 %vm502_vm0, %v3955_v1 }
 0x1e9   : > { %v3663_v48 = vpop.eup %3662 }
 0x1ea   : > { %v834_v49 = vsub.f32 1.0, %v3663_v48  ;;  %v833_v51 = vmul.f32 0.0, %v3663_v48 }
 0x29c   : > { %v754_v43 = vpop.f32.mrf.mxu1 }
 0x29d   : > { %v828_v44 = vadd.f32 %v827_v24, %v754_v43  ;;  %v3492_v24 = vpop.f32.mrf.mxu0 }
 0x29e   : > { %v3447_v46 = vpop.f32.mrf.mxu1 }
 0x29f   : > { %v831_v47 = vadd.f32 %v828_v44, %v4113_v45 }
 0x2a1   : > { %3664 = vtanh.f32 %v831_v47 }
 0x2ae   : > { %v3665_v50 = vpop.eup %3664 }
 0x2af   : > { %v835_v52 = vmul.f32 %v3665_v50, %v834_v49 }
 0x2b1   : > { %v4116_v53 = vadd.f32 %v835_v52, %v833_v51 }
 0x2b3   : > { %3453 = vmatprep.subr.mxu1 %v4116_v53 }
 0x2b4   : > { %3454 = vmatpush3.msra.mxu1 %v4116_v53 }
 0x2b5   : > { %3456 = vmatmul.mubr.msk.f32.vlgmr.msra.gmra.mxu1 %vm502_vm0, %v3962_v3  ;;  %3463 = vmatprep.subr.mxu1 %v3818_v2 }
 0x2b6   : > { %3465 = vmatprep.mubr.msk.f32.mxu1 %vm3819_vm2, %v3818_v2 }
 0x375   : > { %v3457_v58 = vpop.f32.mrf.mxu1 }
 0x376   : > { %v991_v59 = vadd.f32 %v3462_v54, %v3457_v58  ;;  %v3502_v54 = vpop.f32.mrf.mxu0 }
 0x377   : > { %v907_v5 = vpop.f32.mrf.mxu1 }
 0x378   : > { %v995_v60 = vadd.f32 %v991_v59, %v4098_v28  ;;  %v986_v6 = vadd.f32 %v985_v55, %v907_v5  ;;  %v1621_v55 = vpop.f32.mrf.mxu0 }
 0x37a   : > { %v3265_v61 = vmul.f32 -1.442695, %v995_v60  ;;  %v994_v7 = vadd.f32 %v986_v6, %v4110_v38 }
 0x37c   : > { %3666 = vpow2.f32 %v3265_v61  ;;  %v3264_v8 = vmul.f32 -1.442695, %v994_v7 }
 0x389   : > { %v3667_v62 = vpop.eup %3666 }
 0x38a   : > { %v1003_v63 = vadd.f32 1.0, %v3667_v62 }
 0x38c   : > { %3668 = vrcp.f32 %v1003_v63 }
 0x38d   : > { %3670 = vpow2.f32 %v3264_v8 }
 0x399   : > { %v3669_v0 = vpop.eup %3668 }
 0x39a   : > { %v1008_v4 = vmul.f32 %v3669_v0, %v4116_v53  ;;  %v3671_v9 = vpop.eup %3670 }
 0x39b   : > { %v1002_v10 = vadd.f32 1.0, %v3671_v9 }
 0x39c   : > { %3464 = vmatpush3.msra.mxu1 %v1008_v4 }
 0x39d   : > { %3466 = vmatmul.mubr.msk.f32.vlgmr.msra.gmra.mxu1 %vm502_vm0, %v4104_v35  ;;  %3672 = vrcp.f32 %v1002_v10 }
 0x39e   : > { %3475 = vmatprep.mubr.msk.f32.mxu1 %vm502_vm0, %v3955_v1 }
 0x3aa   : > { %v3673_v15 = vpop.eup %3672 }
 0x3ab   : > { %v1152_v16 = vsub.f32 1.0, %v3673_v15  ;;  %v1151_v18 = vmul.f32 %v3673_v15, %v4116_v53 }
 0x45d   : > { %v1075_v11 = vpop.f32.mrf.mxu1 }
 0x45e   : > { %v1146_v12 = vadd.f32 %v1145_v56, %v1075_v11  ;;  %v1781_v56 = vpop.f32.mrf.mxu0 }
 0x45f   : > { %v3467_v13 = vpop.f32.mrf.mxu1 }
 0x460   : > { %v1149_v14 = vadd.f32 %v1146_v12, %v4113_v45  ;;  %v3512_v57 = vpop.f32.mrf.mxu0 }
 0x462   : > { %3674 = vtanh.f32 %v1149_v14 }
 0x46f   : > { %v3675_v17 = vpop.eup %3674 }
 0x470   : > { %v1153_v19 = vmul.f32 %v3675_v17, %v1152_v16 }
 0x472   : > { %v4134_v20 = vadd.f32 %v1153_v19, %v1151_v18 }
 0x474   : > { %3473 = vmatprep.subr.mxu1 %v4134_v20 }
 0x475   : > { %3474 = vmatpush3.msra.mxu1 %v4134_v20 }
 0x476   : > { %3476 = vmatmul.mubr.msk.f32.vlgmr.msra.gmra.mxu1 %vm502_vm0, %v3962_v3  ;;  %3483 = vmatprep.subr.mxu1 %v3818_v2 }
 0x477   : > { %3485 = vmatprep.mubr.msk.f32.mxu1 %vm3819_vm2, %v3818_v2 }
 0x536   : > { %v3477_v25 = vpop.f32.mrf.mxu1 }
 0x537   : > { %v1309_v26 = vadd.f32 %v3482_v21, %v3477_v25 }
 0x538   : > { %v1225_v34 = vpop.f32.mrf.mxu1 }
 0x539   : > { %v1313_v27 = vadd.f32 %v1309_v26, %v4098_v28  ;;  %v1304_v36 = vadd.f32 %v1303_v22, %v1225_v34  ;;  %v3522_v22 = vpop.f32.mrf.mxu0 }
 0x53b   : > { %v3276_v29 = vmul.f32 -1.442695, %v1313_v27  ;;  %v1312_v37 = vadd.f32 %v1304_v36, %v4110_v38 }
 0x53d   : > { %3676 = vpow2.f32 %v3276_v29  ;;  %v3275_v39 = vmul.f32 -1.442695, %v1312_v37 }
 0x54a   : > { %v3677_v30 = vpop.eup %3676 }
 0x54b   : > { %v1321_v31 = vadd.f32 1.0, %v3677_v30 }
 0x54d   : > { %3678 = vrcp.f32 %v1321_v31 }
 0x54e   : > { %3680 = vpow2.f32 %v3275_v39 }
 0x55a   : > { %v3679_v32 = vpop.eup %3678 }
 0x55b   : > { %v1326_v33 = vmul.f32 %v3679_v32, %v4134_v20  ;;  %v3681_v40 = vpop.eup %3680 }
 0x55c   : > { %v1320_v41 = vadd.f32 1.0, %v3681_v40 }
 0x55d   : > { %3484 = vmatpush3.msra.mxu1 %v1326_v33 }
 0x55e   : > { %3486 = vmatmul.mubr.msk.f32.vlgmr.msra.gmra.mxu1 %vm502_vm0, %v4104_v35  ;;  %3682 = vrcp.f32 %v1320_v41 }
 0x55f   : > { %3495 = vmatprep.mubr.msk.f32.mxu1 %vm502_vm0, %v3955_v1 }
 0x56b   : > { %v3683_v47 = vpop.eup %3682 }
 0x56c   : > { %v1470_v48 = vsub.f32 1.0, %v3683_v47  ;;  %v1469_v50 = vmul.f32 %v3683_v47, %v4134_v20 }
 0x61e   : > { %v1393_v42 = vpop.f32.mrf.mxu1 }
 0x61f   : > { %v1464_v43 = vadd.f32 %v1463_v23, %v1393_v42  ;;  %v1939_v23 = vpop.f32.mrf.mxu0 }
 0x620   : > { %v3487_v44 = vpop.f32.mrf.mxu1 }
 0x621   : > { %v1467_v46 = vadd.f32 %v1464_v43, %v4113_v45  ;;  %v2099_v24 = vpop.f32.mrf.mxu0 }
 0x623   : > { %3684 = vtanh.f32 %v1467_v46  ;;  %v3532_v25 = vpop.f32.mrf.mxu0 }
 0x630   : > { %v3685_v49 = vpop.eup %3684 }
 0x631   : > { %v1471_v51 = vmul.f32 %v3685_v49, %v1470_v48 }
 0x633   : > { %v4152_v52 = vadd.f32 %v1471_v51, %v1469_v50 }
 0x635   : > { %3493 = vmatprep.subr.mxu1 %v4152_v52 }
 0x636   : > { %3494 = vmatpush3.msra.mxu1 %v4152_v52 }
 0x637   : > { %3496 = vmatmul.mubr.msk.f32.vlgmr.msra.gmra.mxu1 %vm502_vm0, %v3962_v3  ;;  %3503 = vmatprep.subr.mxu1 %v3818_v2 }
 0x638   : > { %3505 = vmatprep.mubr.msk.f32.mxu1 %vm3819_vm2, %v3818_v2 }
 0x6f7   : > { %v3497_v58 = vpop.f32.mrf.mxu1 }
 0x6f8   : > { %v1627_v59 = vadd.f32 %v3502_v54, %v3497_v58 }
 0x6f9   : > { %v1543_v5 = vpop.f32.mrf.mxu1 }
 0x6fa   : > { %v1631_v60 = vadd.f32 %v1627_v59, %v4098_v28  ;;  %v1622_v6 = vadd.f32 %v1621_v55, %v1543_v5 }
 0x6fc   : > { %v3287_v61 = vmul.f32 -1.442695, %v1631_v60  ;;  %v1630_v7 = vadd.f32 %v1622_v6, %v4110_v38 }
 0x6fe   : > { %3686 = vpow2.f32 %v3287_v61  ;;  %v3286_v8 = vmul.f32 -1.442695, %v1630_v7 }
 0x70b   : > { %v3687_v62 = vpop.eup %3686 }
 0x70c   : > { %v1639_v63 = vadd.f32 1.0, %v3687_v62 }
 0x70e   : > { %3688 = vrcp.f32 %v1639_v63 }
 0x70f   : > { %3690 = vpow2.f32 %v3286_v8 }
 0x71b   : > { %v3689_v0 = vpop.eup %3688 }
 0x71c   : > { %v1644_v4 = vmul.f32 %v3689_v0, %v4152_v52  ;;  %v3691_v9 = vpop.eup %3690 }
 0x71d   : > { %v1638_v10 = vadd.f32 1.0, %v3691_v9 }
 0x71e   : > { %3504 = vmatpush3.msra.mxu1 %v1644_v4 }
 0x71f   : > { %3506 = vmatmul.mubr.msk.f32.vlgmr.msra.gmra.mxu1 %vm502_vm0, %v4104_v35  ;;  %3692 = vrcp.f32 %v1638_v10 }
 0x720   : > { %3515 = vmatprep.mubr.msk.f32.mxu1 %vm502_vm0, %v3955_v1 }
 0x72c   : > { %v3693_v15 = vpop.eup %3692 }
 0x72d   : > { %v1788_v16 = vsub.f32 1.0, %v3693_v15  ;;  %v1787_v18 = vmul.f32 %v3693_v15, %v4152_v52 }
 0x7df   : > { %v1711_v11 = vpop.f32.mrf.mxu1 }
 0x7e0   : > { %v1782_v12 = vadd.f32 %v1781_v56, %v1711_v11  ;;  %v3542_v56 = vpop.f32.mrf.mxu0 }
 0x7e1   : > { %v3507_v13 = vpop.f32.mrf.mxu1 }
 0x7e2   : > { %v1785_v14 = vadd.f32 %v1782_v12, %v4113_v45  ;;  %v2257_v57 = vpop.f32.mrf.mxu0 }
 0x7e4   : > { %3694 = vtanh.f32 %v1785_v14  ;;  %v2417_v58 = vpop.f32.mrf.mxu0 }
 0x7e6   : > { %v3552_v59 = vpop.f32.mrf.mxu0 }
 0x7e8   : > { %v3562_v25 = vpop.f32.mrf.mxu0 }
 0x7f1   : > { %v3695_v17 = vpop.eup %3694 }
 0x7f2   : > { %v1789_v19 = vmul.f32 %v3695_v17, %v1788_v16 }
 0x7f4   : > { %v4170_v21 = vadd.f32 %v1789_v19, %v1787_v18 }
 0x7f6   : > { %3513 = vmatprep.subr.mxu1 %v4170_v21 }
 0x7f7   : > { %3514 = vmatpush3.msra.mxu1 %v4170_v21 }
 0x7f8   : > { %3516 = vmatmul.mubr.msk.f32.vlgmr.msra.gmra.mxu1 %vm502_vm0, %v3962_v3  ;;  %3523 = vmatprep.subr.mxu1 %v3818_v2 }
 0x7f9   : > { %3525 = vmatprep.mubr.msk.f32.mxu1 %vm3819_vm2, %v3818_v2 }
 0x8b8   : > { %v3517_v26 = vpop.f32.mrf.mxu1 }
 0x8b9   : > { %v1945_v27 = vadd.f32 %v3522_v22, %v3517_v26  ;;  %v2575_v26 = vpop.f32.mrf.mxu0 }
 0x8ba   : > { %v1861_v36 = vpop.f32.mrf.mxu1 }
 0x8bb   : > { %v1949_v29 = vadd.f32 %v1945_v27, %v4098_v28  ;;  %v1940_v37 = vadd.f32 %v1939_v23, %v1861_v36  ;;  %v2735_v27 = vpop.f32.mrf.mxu0 }
 0x8bd   : > { %v3298_v30 = vmul.f32 -1.442695, %v1949_v29  ;;  %v1948_v39 = vadd.f32 %v1940_v37, %v4110_v38  ;;  %v3572_v29 = vpop.f32.mrf.mxu0 }
 0x8be   : > { %v2428_v29 = vstv %s3313_s24 }
 0x8bf   : > { %3696 = vpow2.f32 %v3298_v30  ;;  %v3297_v40 = vmul.f32 -1.442695, %v1948_v39  ;;  %v3582_v59 = vpop.f32.mrf.mxu0 }
 0x8cc   : > { %v3697_v31 = vpop.eup %3696 }
 0x8cd   : > { %v1957_v32 = vadd.f32 1.0, %v3697_v31 }
 0x8cf   : > { %3698 = vrcp.f32 %v1957_v32 }
 0x8d0   : > { %3700 = vpow2.f32 %v3297_v40 }
 0x8dc   : > { %v3699_v33 = vpop.eup %3698 }
 0x8dd   : > { %v1962_v34 = vmul.f32 %v3699_v33, %v4170_v21  ;;  %v3701_v41 = vpop.eup %3700 }
 0x8de   : > { %v1956_v42 = vadd.f32 1.0, %v3701_v41 }
 0x8df   : > { %3524 = vmatpush3.msra.mxu1 %v1962_v34 }
 0x8e0   : > { %3526 = vmatmul.mubr.msk.f32.vlgmr.msra.gmra.mxu1 %vm502_vm0, %v4104_v35  ;;  %3702 = vrcp.f32 %v1956_v42 }
 0x8e1   : > { %3535 = vmatprep.mubr.msk.f32.mxu1 %vm502_vm0, %v3955_v1 }
 0x8ed   : > { %v3703_v48 = vpop.eup %3702 }
 0x8ee   : > { %v2106_v49 = vsub.f32 1.0, %v3703_v48  ;;  %v2105_v51 = vmul.f32 %v3703_v48, %v4170_v21 }
 0x9a0   : > { %v2029_v43 = vpop.f32.mrf.mxu1 }
 0x9a1   : > { %v2100_v44 = vadd.f32 %v2099_v24, %v2029_v43 }
 0x9a2   : > { %v3527_v46 = vpop.f32.mrf.mxu1 }
 0x9a3   : > { %v2103_v47 = vadd.f32 %v2100_v44, %v4113_v45 }
 0x9a5   : > { %3704 = vtanh.f32 %v2103_v47 }
 0x9b2   : > { %v3705_v50 = vpop.eup %3704 }
 0x9b3   : > { %v2107_v54 = vmul.f32 %v3705_v50, %v2106_v49 }
 0x9b5   : > { %v4188_v55 = vadd.f32 %v2107_v54, %v2105_v51 }
 0x9b7   : > { %3533 = vmatprep.subr.mxu1 %v4188_v55 }
 0x9b8   : > { %3534 = vmatpush3.msra.mxu1 %v4188_v55 }
 0x9b9   : > { %3536 = vmatmul.mubr.msk.f32.vlgmr.msra.gmra.mxu1 %vm502_vm0, %v3962_v3  ;;  %3543 = vmatprep.subr.mxu1 %v3818_v2 }
 0x9ba   : > { %3545 = vmatprep.mubr.msk.f32.mxu1 %vm3819_vm2, %v3818_v2 }
 0xa79   : > { %v3537_v60 = vpop.f32.mrf.mxu1 }
 0xa7a   : > { %v2263_v61 = vadd.f32 %v3542_v56, %v3537_v60  ;;  %v2893_v60 = vpop.f32.mrf.mxu0 }
 0xa7b   : > { %v2179_v7 = vpop.f32.mrf.mxu1 }
 0xa7c   : > { %v2267_v62 = vadd.f32 %v2263_v61, %v4098_v28  ;;  %v2258_v8 = vadd.f32 %v2257_v57, %v2179_v7  ;;  %v3053_v61 = vpop.f32.mrf.mxu0 }
 0xa7e   : > { %v3309_v63 = vmul.f32 -1.442695, %v2267_v62  ;;  %v2266_v9 = vadd.f32 %v2258_v8, %v4110_v38  ;;  %v3592_v62 = vpop.f32.mrf.mxu0 }
 0xa80   : > { %3706 = vpow2.f32 %v3309_v63  ;;  %v3308_v10 = vmul.f32 -1.442695, %v2266_v9 }
 0xa8d   : > { %v3707_v0 = vpop.eup %3706 }
 0xa8e   : > { %v2275_v4 = vadd.f32 1.0, %v3707_v0 }
 0xa90   : > { %3708 = vrcp.f32 %v2275_v4 }
 0xa91   : > { %3710 = vpow2.f32 %v3308_v10 }
 0xa9d   : > { %v3709_v5 = vpop.eup %3708 }
 0xa9e   : > { %v2280_v6 = vmul.f32 %v3709_v5, %v4188_v55  ;;  %v3711_v11 = vpop.eup %3710 }
 0xa9f   : > { %v2274_v12 = vadd.f32 1.0, %v3711_v11 }
 0xaa0   : > { %3544 = vmatpush3.msra.mxu1 %v2280_v6 }
 0xaa1   : > { %3546 = vmatmul.mubr.msk.f32.vlgmr.msra.gmra.mxu1 %vm502_vm0, %v4104_v35  ;;  %3712 = vrcp.f32 %v2274_v12 }
 0xaa2   : > { %3555 = vmatprep.mubr.msk.f32.mxu1 %vm502_vm0, %v3955_v1 }
 0xaae   : > { %v3713_v17 = vpop.eup %3712 }
 0xaaf   : > { %v2424_v18 = vsub.f32 1.0, %v3713_v17  ;;  %v2423_v22 = vmul.f32 %v3713_v17, %v4188_v55  ;;  %v838_v17 = vstv %s837_s14 }
 0xb61   : > { %v2347_v13 = vpop.f32.mrf.mxu1 }
 0xb62   : > { %v2418_v14 = vadd.f32 %v2417_v58, %v2347_v13 }
 0xb63   : > { %v3547_v15 = vpop.f32.mrf.mxu1 }
 0xb64   : > { %v2421_v16 = vadd.f32 %v2418_v14, %v4113_v45 }
 0xb66   : > { %3714 = vtanh.f32 %v2421_v16 }
 0xb73   : > { %v3715_v19 = vpop.eup %3714 }
 0xb74   : > { %v2425_v23 = vmul.f32 %v3715_v19, %v2424_v18  ;;  %v1792_v19 = vstv %s3291_s16 }
 0xb76   : > { %v4206_v24 = vadd.f32 %v2425_v23, %v2423_v22  ;;  %v839_v22 = vmul.f32 %v838_v17, %v4116_v53 }
 0xb78   : > { %3553 = vmatprep.subr.mxu1 %v4206_v24 }
 0xb79   : > { %3554 = vmatpush3.msra.mxu1 %v4206_v24 }
 0xb7a   : > { %3556 = vmatmul.mubr.msk.f32.vlgmr.msra.gmra.mxu1 %vm502_vm0, %v3962_v3  ;;  %3563 = vmatprep.subr.mxu1 %v3818_v2 }
 0xb7b   : > { %3565 = vmatprep.mubr.msk.f32.mxu1 %vm3819_vm2, %v3818_v2 }
 0xc3a   : > { %v3557_v30 = vpop.f32.mrf.mxu1 }
 0xc3b   : > { %v2581_v31 = vadd.f32 %v3562_v25, %v3557_v30  ;;  %v2110_v25 = vstv %s3302_s22 }
 0xc3c   : > { %v2497_v40 = vpop.f32.mrf.mxu1 }
 0xc3d   : > { %v2585_v32 = vadd.f32 %v2581_v31, %v4098_v28  ;;  %v2576_v41 = vadd.f32 %v2575_v26, %v2497_v40  ;;  %v2111_v31 = vmul.f32 %v2110_v25, %v4188_v55 }
 0xc3f   : > { %v3320_v33 = vmul.f32 -1.442695, %v2585_v32  ;;  %v2584_v42 = vadd.f32 %v2576_v41, %v4110_v38  ;;  %v2746_v32 = vstv %s3324_s25 }
 0xc41   : > { %3716 = vpow2.f32 %v3320_v33  ;;  %v3319_v43 = vmul.f32 -1.442695, %v2584_v42 }
 0xc4e   : > { %v3717_v34 = vpop.eup %3716 }
 0xc4f   : > { %v2593_v36 = vadd.f32 1.0, %v3717_v34  ;;  %v2429_v34 = vmul.f32 %v2428_v29, %v4206_v24 }
 0xc51   : > { %3718 = vrcp.f32 %v2593_v36 }
 0xc52   : > { %3720 = vpow2.f32 %v3319_v43 }
 0xc5e   : > { %v3719_v37 = vpop.eup %3718 }
 0xc5f   : > { %v2598_v39 = vmul.f32 %v3719_v37, %v4206_v24  ;;  %v3721_v44 = vpop.eup %3720 }
 0xc60   : > { %v2592_v46 = vadd.f32 1.0, %v3721_v44 }
 0xc61   : > { %3564 = vmatpush3.msra.mxu1 %v2598_v39 }
 0xc62   : > { %3566 = vmatmul.mubr.msk.f32.vlgmr.msra.gmra.mxu1 %vm502_vm0, %v4104_v35  ;;  %3722 = vrcp.f32 %v2592_v46  ;;  %v3073_v46 = vpop.permute.xlu1 %3072 }
 0xc63   : > { %3575 = vmatprep.mubr.msk.f32.mxu1 %vm502_vm0, %v3955_v1 }
 0xc6f   : > { %v3723_v51 = vpop.eup %3722 }
 0xc70   : > { %v2742_v54 = vsub.f32 1.0, %v3723_v51  ;;  %v2741_v1 = vmul.f32 %v3723_v51, %v4206_v24  ;;  %v3068_v24 = vld [vmem:[%s4303_s9] sm:$0xf] }
 0xd22   : > { %v2665_v47 = vpop.f32.mrf.mxu1 }
 0xd23   : > { %v2736_v48 = vadd.f32 %v2735_v27, %v2665_v47  ;;  %v1793_v27 = vmul.f32 %v1792_v19, %v4170_v21  ;;  %v3064_v21 = vstv %s3335_s29 }
 0xd24   : > { %v3567_v49 = vpop.f32.mrf.mxu1 }
 0xd25   : > { %v2739_v50 = vadd.f32 %v2736_v48, %v4113_v45 }
 0xd27   : > { %3724 = vtanh.f32 %v2739_v50 }
 0xd34   : > { %v3725_v56 = vpop.eup %3724 }
 0xd35   : > { %v2743_v57 = vmul.f32 %v3725_v56, %v2742_v54 }
 0xd37   : > { %v4224_v58 = vadd.f32 %v2743_v57, %v2741_v1 }
 0xd39   : > { %3573 = vmatprep.subr.mxu1 %v4224_v58 }
 0xd3a   : > { %3574 = vmatpush3.msra.mxu1 %v4224_v58 }
 0xd3b   : > { %3576 = vmatmul.mubr.msk.f32.vlgmr.msra.gmra.mxu1 %vm502_vm0, %v3962_v3  ;;  %3583 = vmatprep.subr.mxu1 %v3818_v2 }
 0xd3c   : > { %3585 = vmatprep.mubr.msk.f32.mxu1 %vm3819_vm2, %v3818_v2 }
 0xdfb   : > { %v3577_v63 = vpop.f32.mrf.mxu1 }
 0xdfc   : > { %v2899_v0 = vadd.f32 %v3582_v59, %v3577_v63 }
 0xdfd   : > { %v2815_v9 = vpop.f32.mrf.mxu1 }
 0xdfe   : > { %v2903_v4 = vadd.f32 %v2899_v0, %v4098_v28  ;;  %v2894_v10 = vadd.f32 %v2893_v60, %v2815_v9 }
 0xe00   : > { %v3331_v5 = vmul.f32 -1.442695, %v2903_v4  ;;  %v2902_v28 = vadd.f32 %v2894_v10, %v4110_v38  ;;  %v1474_v38 = vstv %s3280_s15  ;;  %s3338_s15 = sshll.u32 %s3903_s21, 6  ;;  %s3821_s21 = smov [#allocation5]  }
 0xe01   : > { %v1475_v23 = vmul.f32 %v1474_v38, %v4152_v52  ;;  %v2747_v52 = vmul.f32 %v2746_v32, %v4224_v58  ;;  %s4259_s29 = scalar_lea.hbm %s4305_s11, %s3338_s15 }
 0xe02   : > { %3726 = vpow2.f32 %v3331_v5  ;;  %v3330_v11 = vmul.f32 -1.442695, %v2902_v28 }
 0xe0f   : > { %v3727_v6 = vpop.eup %3726 }
 0xe10   : > { %v2911_v7 = vadd.f32 1.0, %v3727_v6 }
 0xe12   : > { %3728 = vrcp.f32 %v2911_v7 }
 0xe13   : > { %3730 = vpow2.f32 %v3330_v11 }
 0xe1f   : > { %v3729_v8 = vpop.eup %3728 }
 0xe20   : > { %v2916_v3 = vmul.f32 %v3729_v8, %v4224_v58  ;;  %v3731_v12 = vpop.eup %3730 }
 0xe21   : > { %v2910_v13 = vadd.f32 1.0, %v3731_v12 }
 0xe22   : > { %3584 = vmatpush3.msra.mxu1 %v2916_v3 }
 0xe23   : > { %3586 = vmatmul.mubr.msk.f32.vlgmr.msra.gmra.mxu1 %vm502_vm0, %v4104_v35  ;;  %3593 = vmatprep.subr.mxu1 %v3818_v2  ;;  %3732 = vrcp.f32 %v2910_v13 }
 0xe24   : > { %3595 = vmatprep.mubr.msk.f32.mxu1 %vm3819_vm2, %v3818_v2  ;;  %v1156_v2 = vstv %s3269_s13  ;;  %s391_s13 = sand.u32 1, %s3807_s18  }
 0xe25   : > { %v1157_v18 = vmul.f32 %v1156_v2, %v4134_v20  ;;  %s3241_s14 = sshll.u32 %s391_s13, 2  ;;  %s3151_s30 = scalar_lea.sflag [#allocation3], %s391_s13 }
 0xe26   : > { %s393_s16 = scalar_lea.vmem [#allocation5], %s3241_s14  ;;  %s3755_s14 = sshll.u32 %s3821_s21, 4  ;;  %s3756_s14 = int_to_ptr.vmem [resolvable:$false] %s3755_s14 }
 0xe27   : > { %v1158_v26 = vadd.f32 %v1157_v18, %v839_v22  ;;  %s3164_s22 = sshll.u32 %s393_s16, 4  ;;  %s3757_s0 = scalar_lea.vmem %s3756_s14, 128  ;;  %s3165_s22 = int_to_ptr.vmem [resolvable:$true] %s3164_s22 }
 0xe28   : > { %s3751_s12 = scalar_lea.vmem %s3165_s22, 64  ;;  %p3758_p13 = scmp.lt.s32.totalorder %s3165_s22, %s3756_s14 }
 0xe29   : > { %v1476_v30 = vadd.f32 %v1475_v23, %v1158_v26  ;;  %p3752_p9 = scmp.ne.s32.totalorder %s3165_s22, %s3751_s12  ;;  %p3759_p0 = scmp.lt.s32.totalorder %s3757_s0, %s3751_s12 }
 0xe2b   : > { %v1794_v33 = vadd.f32 %v1793_v27, %v1476_v30  ;;  %p3753_p10 = pnand %p3752_p9, %p3920_p5  ;;  %p3760_p1 = por %p3759_p0, %p3758_p13 }
 0xe2d   : > { %v2112_v53 = vadd.f32 %v2111_v31, %v1794_v33  ;;  %p3754_p12 = pneg %p3753_p10 }
 0xe2f   : > { %v2430_v40 = vadd.f32 %v2429_v34, %v2112_v53  ;;  %p3761_p2 = pnand %p3760_p1, %p3754_p12 }
 0xe31   : > { %v2748_v42 = vadd.f32 %v2747_v52, %v2430_v40 }
 0xee3   : > { %v2983_v14 = vpop.f32.mrf.mxu1 }
 0xee4   : > { %v3054_v15 = vadd.f32 %v3053_v61, %v2983_v14 }
 0xee5   : > { %v3587_v35 = vpop.f32.mrf.mxu1 }
 0xee6   : > { %v3057_v16 = vadd.f32 %v3054_v15, %v4113_v45  ;;  %v3733_v45 = vpop.eup %3732 }
 0xee7   : > { %v3060_v20 = vsub.f32 1.0, %v3733_v45  ;;  %v3059_v37 = vmul.f32 %v3733_v45, %v4224_v58 }
 0xee8   : > { %3734 = vtanh.f32 %v3057_v16 }
 0xef5   : > { %v3735_v36 = vpop.eup %3734 }
 0xef6   : > { %v3061_v39 = vmul.f32 %v3735_v36, %v3060_v20 }
 0xef8   : > { %v3062_v41 = vadd.f32 %v3061_v39, %v3059_v37 }
 0xefa   : > { %v3065_v43 = vmul.f32 %v3064_v21, %v3062_v41 }
 0xefc   : > { %v3066_v55 = vadd.f32 %v3065_v43, %v2748_v42 }
 0xefe   : > { %v3067_v44 = vmax.f32 %v3066_v55, 0.0 }
 0xf00   : > { %3594 = vmatpush3.msra.mxu1 %v3067_v44 }
 0xf01   : > { %3596 = vmatmul.mubr.msk.f32.vlgmr.msra.gmra.mxu1 %vm502_vm0, %v3068_v24 }
 0xfc1   : > { %v3144_v47 = vpop.f32.mrf.mxu1 }
 0xfc2   : > { %v3145_v48 = vadd.f32 %v3144_v47, %v3073_v46 }
 0xfc3   : > { %v3597_v49 = vpop.f32.mrf.mxu1 }
 0xfc4   : > { %3149 = vst.msk [vmem:[%s393_s16] sm:$0xf] %vm3148_vm5, %v3145_v48 }
 0xfc5   : > { %3764 = shalt.err (!%p3761_p2)
}
 0xfc6   : > { %s3765_s15 = scalar_lea.hbm %s4259_s29, 64  ;;  %s3769_s24 = scalar_lea.hbm %s4305_s11, 128 }
 0xfc7   : > { %p3766_p3 = scmp.ne.s32.totalorder %s4259_s29, %s3765_s15  ;;  %p3770_p8 = scmp.lt.s32.totalorder %s4259_s29, %s4305_s11 }
 0xfc8   : > { %p3771_p11 = scmp.lt.s32.totalorder %s3769_s24, %s3765_s15 }
 0xfc9   : > { %p3767_p4 = pnand %p3766_p3, %p3920_p5 }
 0xfca   : > { %p3772_p9 = por %p3771_p11, %p3770_p8 }
 0xfcb   : > { %p3768_p7 = pneg %p3767_p4 }
 0xfcd   : > { %p3773_p10 = pnand %p3772_p9, %p3768_p7 }
 0xfcf   : > { %3776 = shalt.err (!%p3773_p10)
}
 0xfd0   : > { %3602 = dma.vmem_to_hbm [thread:$0]  (%p3920_p5), %s3165_s22, 64, %s4259_s29, %s3151_s30  }
 0xfd1 PF: > { %p3614_p12 = scmp.ge.s32.totalorder %s3815_s20, 2  ;;  %s3176_s0 = sand.u32 1, %s3803_s17  }
 0xfd2   : > { %s3177_s12 = scalar_lea.sflag [#allocation3], %s3176_s0 }
 0xfd3   : > { %p3609_p13 = pnand %p3614_p12, %p3924_p6 }
 0xfd5   : > { %p3610_p0 = pneg %p3609_p13 }
 0xfd7   : > { %3798 = dma.done.wait (%p3610_p0), %s3177_s12, 64  }
 0xfd8   : > { %3800 = vsyncadd (%p3610_p0), %s3177_s12, 4294967232  ;;  %p22_p1 = scmp.ge.s32.totalorder %s3907_s23, 4   ;;  %s4311_s17 = smov %s3807_s18 }
 0xfd9   : > { %s4312_s18 = smov %s3811_s19  ;;  %s4313_s19 = smov %s3918_s26 }
 0xfda   : > { %s4314_s20 = smov %s3907_s23  ;;  %24 = sbr.rel (!%p22_p1) target bundleno = 6 (0x6), region = 104 }
 0xfdf   :  { %3182 = vsyncpa [#allocation3], 1 }
 0xfe0   :  { %3184 = vsyncpa [#allocation3 + $0x1], 1 }
 0xfe1   :  { %3185 = vsyncpa [#allocation4], 1 }
 0xfe2   :  { %3187 = vsyncpa [#allocation4 + $0x1], 1 }

</bundles_post_ra>
